<compile_context>
chip_gen: v7x
topology: tpu7x:2x2x1
jax: 0.10.0
libtpu: 0.0.40
codegen_flags: <defaults>
</compile_context>

<pallas_src>
import math

import jax
import jax.numpy as jnp
from jax import lax
from jax.experimental import pallas as pl
from jax.experimental.pallas import tpu as pltpu


def lstm_model_kernel(x_ref, wih0_ref, whh0_ref, b0_ref, wih1_ref, whh1_ref,
                      b1_ref, wfc_ref, bfc_ref, out_ref):
    SB, I = x_ref.shape            # (S*B, I)
    H = whh0_ref.shape[0]
    B = out_ref.shape[0]
    S = SB // B
    f32 = jnp.float32

    # Loop-invariant weights / pre-broadcast biases (loaded once, hoisted).
    whh0 = whh0_ref[...]           # (H, 4H)
    wih1 = wih1_ref[...]           # (H, 4H)
    whh1 = whh1_ref[...]           # (H, 4H)
    b1 = b1_ref[...]               # (B, 4H)
    wfc = wfc_ref[...]             # (H, I)
    bfc = bfc_ref[...]             # (SB, I)

    # ---- Prologue: hoisted layer-0 input projection, one big-M MXU push. ----
    # xg[t*B:(t+1)*B] holds x_t @ wih0_T + (b_ih0 + b_hh0) for timestep t.
    xg = jnp.dot(x_ref[...], wih0_ref[...],
                 preferred_element_type=f32) + b0_ref[...]        # (SB, 4H)

    def split_gates(gates):
        # sigmoid(x) == 0.5*tanh(0.5*x) + 0.5 : pure EUP tanh, no exp/divide.
        sig = 0.5 * jnp.tanh(0.5 * gates) + 0.5                   # (B, 4H)
        th = jnp.tanh(gates)                                      # (B, 4H)
        # PyTorch gate order: i, f, g, o (lane slices of the full-vreg results).
        return sig[:, 0:H], sig[:, H:2 * H], th[:, 2 * H:3 * H], sig[:, 3 * H:4 * H]

    def cell(gates, c):
        i_g, f_g, g_g, o_g = split_gates(gates)
        c_n = f_g * c + i_g * g_g
        h_n = o_g * jnp.tanh(c_n)
        return h_n, c_n

    zh = jnp.zeros((B, H), f32)

    # ---- t = 0, layer 0 only (h0_{-1} = c0_{-1} = 0, so gates == xg[0]). ----
    i_g, _, g_g, o_g = split_gates(xg[0:B])
    c0 = i_g * g_g
    h0 = o_g * jnp.tanh(c0)

    h1, c1 = zh, zh
    h1_list = []

    # ---- Skewed recurrence: iteration t does layer-0 step t AND layer-1 step
    # t-1.  Both gate matmuls read the same h0_{t-1} and are independent of each
    # other, so the scheduler can overlap the two layers' MXU/EUP work. ----
    for t in range(1, S):
        g0 = xg[t * B:(t + 1) * B] + jnp.dot(h0, whh0, preferred_element_type=f32)
        g1 = (jnp.dot(h0, wih1, preferred_element_type=f32)
              + jnp.dot(h1, whh1, preferred_element_type=f32) + b1)
        h0_new, c0 = cell(g0, c0)
        h1, c1 = cell(g1, c1)
        h1_list.append(h1)
        h0 = h0_new

    # ---- Drain the skew: layer-1 step S-1. ----
    g1 = (jnp.dot(h0, wih1, preferred_element_type=f32)
          + jnp.dot(h1, whh1, preferred_element_type=f32) + b1)
    h1, c1 = cell(g1, c1)
    h1_list.append(h1)

    # ---- Deferred FC + ReLU + mean over the sequence: one (SB,H)@(H,I) matmul.
    h1_all = jnp.concatenate(h1_list, axis=0)                     # (SB, H)
    y = jnp.maximum(
        jnp.dot(h1_all, wfc, preferred_element_type=f32) + bfc, 0.0)   # (SB, I)
    acc = y[0:B]
    for t in range(1, S):
        acc = acc + y[t * B:(t + 1) * B]
    out_ref[...] = acc * (1.0 / S)


def lstm_model_forward(x, params):
    S, B, I = x.shape
    H = params["whh0_t"].shape[0]

    # X consumed exactly once as a dense 2-D slab by the hoisted projection.
    x2d = x.reshape(S * B, I)

    # Pre-broadcast biases outside the kernel (no per-step broadcast_in_dim).
    b0 = jnp.broadcast_to(params["b0"], (S * B, 4 * H))
    b1 = jnp.broadcast_to(params["b1"], (B, 4 * H))
    bfc = jnp.broadcast_to(params["bfc"], (S * B, I))

    vmem = pl.BlockSpec(memory_space=pltpu.MemorySpace.VMEM)
    fn = pl.pallas_call(
        lstm_model_kernel,
        out_shape=jax.ShapeDtypeStruct((B, I), jnp.float32),
        in_specs=[vmem] * 9,
        out_specs=vmem,
    )
    return fn(x2d, params["wih0_t"], params["whh0_t"], b0,
              params["wih1_t"], params["whh1_t"], b1,
              params["wfc_t"], bfc)


def init_params(key, input_size, hidden_size):
    """Deterministic params matching nn.LSTM / nn.Linear shapes (uniform +-1/sqrt(H)).

    Weights are stored pre-transposed:
      wih0_t (I, 4H), whh0_t (H, 4H), wih1_t (H, 4H), whh1_t (H, 4H), wfc_t (H, I)
    so every kernel matmul is a plain row-major (M, K) @ (K, N).
    """
    H, I = hidden_size, input_size
    k = 1.0 / math.sqrt(H)
    keys = jax.random.split(key, 10)

    def u(kk, shape):
        return jax.random.uniform(kk, shape, jnp.float32, -k, k)

    # PyTorch shapes: weight_ih_l0 (4H, I), weight_hh_l0 (4H, H), biases (4H,)
    wih0 = u(keys[0], (4 * H, I))
    whh0 = u(keys[1], (4 * H, H))
    b0 = u(keys[2], (4 * H,)) + u(keys[3], (4 * H,))      # bias_ih + bias_hh
    wih1 = u(keys[4], (4 * H, H))
    whh1 = u(keys[5], (4 * H, H))
    b1 = u(keys[6], (4 * H,)) + u(keys[7], (4 * H,))
    # Linear: weight (I, H), bias (I,)
    wfc = u(keys[8], (I, H))
    bfc = u(keys[9], (I,))

    return {
        "wih0_t": wih0.T,                 # (I, 4H)
        "whh0_t": whh0.T,                 # (H, 4H)
        "b0": b0.reshape(1, 4 * H),
        "wih1_t": wih1.T,                 # (H, 4H)
        "whh1_t": whh1.T,                 # (H, 4H)
        "b1": b1.reshape(1, 4 * H),
        "wfc_t": wfc.T,                   # (H, I)
        "bfc": bfc.reshape(1, I),
    }


def reference_forward(x, params):
    """Pure-JAX reference mirroring PyTorch semantics (gate order i, f, g, o)."""
    S, B, I = x.shape
    H = params["whh0_t"].shape[0]

    def layer(inp, wih_t, whh_t, b):
        def step(carry, x_t):
            h, c = carry
            gates = x_t @ wih_t + h @ whh_t + b
            i = jax.nn.sigmoid(gates[:, 0:H])
            f = jax.nn.sigmoid(gates[:, H:2 * H])
            g = jnp.tanh(gates[:, 2 * H:3 * H])
            o = jax.nn.sigmoid(gates[:, 3 * H:4 * H])
            c = f * c + i * g
            h = o * jnp.tanh(c)
            return (h, c), h

        init = (jnp.zeros((B, H), jnp.float32), jnp.zeros((B, H), jnp.float32))
        _, hs = lax.scan(step, init, inp)
        return hs

    h1 = layer(x, params["wih0_t"], params["whh0_t"], params["b0"])
    h2 = layer(h1, params["wih1_t"], params["whh1_t"], params["b1"])
    y = jnp.maximum(h2 @ params["wfc_t"] + params["bfc"], 0.0)
    return jnp.mean(y, axis=0)


if __name__ == "__main__":
    SEQ, BATCH, INPUT_SIZE, HIDDEN_SIZE = 8, 2, 16, 32

    key = jax.random.PRNGKey(0)
    k_x, k_p = jax.random.split(key)
    x = jax.random.normal(k_x, (SEQ, BATCH, INPUT_SIZE), jnp.float32)
    params = init_params(k_p, INPUT_SIZE, HIDDEN_SIZE)

    out = lstm_model_forward(x, params)
    out = jax.block_until_ready(out)

    ref = jax.block_until_ready(reference_forward(x, params))
    assert out.shape == (BATCH, INPUT_SIZE)
    assert jnp.allclose(out, ref, atol=1e-4, rtol=1e-4), "mismatch vs JAX reference"

    print("KERNEL_OK")
</pallas_src>

<mosaic_0001>
module attributes {stable_mosaic.version = 11 : i64} {
  func.func @lstm_model_kernel(%arg0: memref<16x16xf32, #tpu.memory_space<vmem>>, %arg1: memref<16x128xf32, #tpu.memory_space<vmem>>, %arg2: memref<32x128xf32, #tpu.memory_space<vmem>>, %arg3: memref<16x128xf32, #tpu.memory_space<vmem>>, %arg4: memref<32x128xf32, #tpu.memory_space<vmem>>, %arg5: memref<32x128xf32, #tpu.memory_space<vmem>>, %arg6: memref<2x128xf32, #tpu.memory_space<vmem>>, %arg7: memref<32x16xf32, #tpu.memory_space<vmem>>, %arg8: memref<16x16xf32, #tpu.memory_space<vmem>>, %arg9: memref<2x16xf32, #tpu.memory_space<vmem>>) attributes {dimension_semantics = [], scalar_prefetch = 0 : i64, scratch_operands = 0 : i64, tpu.core_type = #tpu.core_type<tc>} {
    %c0 = arith.constant 0 : index
    %c0_0 = arith.constant 0 : index
    %0 = vector.load %arg2[%c0, %c0_0] : memref<32x128xf32, #tpu.memory_space<vmem>>, vector<32x128xf32>
    %c0_1 = arith.constant 0 : index
    %c0_2 = arith.constant 0 : index
    %1 = vector.load %arg4[%c0_1, %c0_2] : memref<32x128xf32, #tpu.memory_space<vmem>>, vector<32x128xf32>
    %c0_3 = arith.constant 0 : index
    %c0_4 = arith.constant 0 : index
    %2 = vector.load %arg5[%c0_3, %c0_4] : memref<32x128xf32, #tpu.memory_space<vmem>>, vector<32x128xf32>
    %c0_5 = arith.constant 0 : index
    %c0_6 = arith.constant 0 : index
    %3 = vector.load %arg6[%c0_5, %c0_6] : memref<2x128xf32, #tpu.memory_space<vmem>>, vector<2x128xf32>
    %c0_7 = arith.constant 0 : index
    %c0_8 = arith.constant 0 : index
    %4 = vector.load %arg7[%c0_7, %c0_8] : memref<32x16xf32, #tpu.memory_space<vmem>>, vector<32x16xf32>
    %c0_9 = arith.constant 0 : index
    %c0_10 = arith.constant 0 : index
    %5 = vector.load %arg8[%c0_9, %c0_10] : memref<16x16xf32, #tpu.memory_space<vmem>>, vector<16x16xf32>
    %c0_11 = arith.constant 0 : index
    %c0_12 = arith.constant 0 : index
    %6 = vector.load %arg0[%c0_11, %c0_12] : memref<16x16xf32, #tpu.memory_space<vmem>>, vector<16x16xf32>
    %c0_13 = arith.constant 0 : index
    %c0_14 = arith.constant 0 : index
    %7 = vector.load %arg1[%c0_13, %c0_14] : memref<16x128xf32, #tpu.memory_space<vmem>>, vector<16x128xf32>
    %cst = arith.constant dense<0.000000e+00> : vector<16x128xf32>
    %8 = tpu.matmul %6, %7, %cst {dimension_numbers = #tpu.dot_dimension_numbers<[1], [0], [0], [1], [0, 0, 1, 1], [], []>} : vector<16x16xf32>, vector<16x128xf32>, vector<16x128xf32> -> vector<16x128xf32>
    %c0_15 = arith.constant 0 : index
    %c0_16 = arith.constant 0 : index
    %9 = vector.load %arg3[%c0_15, %c0_16] : memref<16x128xf32, #tpu.memory_space<vmem>>, vector<16x128xf32>
    %10 = arith.addf %8, %9 : vector<16x128xf32>
    %cst_17 = arith.constant 0.000000e+00 : f32
    %11 = vector.broadcast %cst_17 : f32 to vector<2x32xf32>
    %12 = vector.extract_strided_slice %10 {offsets = [0, 0], sizes = [2, 128], strides = [1, 1]} : vector<16x128xf32> to vector<2x128xf32>
    %cst_18 = arith.constant 5.000000e-01 : f32
    %13 = vector.broadcast %cst_18 : f32 to vector<2x128xf32>
    %14 = arith.mulf %13, %12 : vector<2x128xf32>
    %15 = math.tanh %14 : vector<2x128xf32>
    %cst_19 = arith.constant 5.000000e-01 : f32
    %16 = vector.broadcast %cst_19 : f32 to vector<2x128xf32>
    %17 = arith.mulf %16, %15 : vector<2x128xf32>
    %cst_20 = arith.constant 5.000000e-01 : f32
    %18 = vector.broadcast %cst_20 : f32 to vector<2x128xf32>
    %19 = arith.addf %17, %18 : vector<2x128xf32>
    %20 = math.tanh %12 : vector<2x128xf32>
    %21 = vector.extract_strided_slice %19 {offsets = [0, 0], sizes = [2, 32], strides = [1, 1]} : vector<2x128xf32> to vector<2x32xf32>
    %22 = vector.extract_strided_slice %20 {offsets = [0, 64], sizes = [2, 32], strides = [1, 1]} : vector<2x128xf32> to vector<2x32xf32>
    %23 = vector.extract_strided_slice %19 {offsets = [0, 96], sizes = [2, 32], strides = [1, 1]} : vector<2x128xf32> to vector<2x32xf32>
    %24 = arith.mulf %21, %22 : vector<2x32xf32>
    %25 = math.tanh %24 : vector<2x32xf32>
    %26 = arith.mulf %23, %25 : vector<2x32xf32>
    %27 = vector.extract_strided_slice %10 {offsets = [2, 0], sizes = [2, 128], strides = [1, 1]} : vector<16x128xf32> to vector<2x128xf32>
    %cst_21 = arith.constant dense<0.000000e+00> : vector<2x128xf32>
    %28 = tpu.matmul %26, %0, %cst_21 {dimension_numbers = #tpu.dot_dimension_numbers<[1], [0], [0], [1], [0, 0, 1, 1], [], []>} : vector<2x32xf32>, vector<32x128xf32>, vector<2x128xf32> -> vector<2x128xf32>
    %29 = arith.addf %27, %28 : vector<2x128xf32>
    %cst_22 = arith.constant dense<0.000000e+00> : vector<2x128xf32>
    %30 = tpu.matmul %26, %1, %cst_22 {dimension_numbers = #tpu.dot_dimension_numbers<[1], [0], [0], [1], [0, 0, 1, 1], [], []>} : vector<2x32xf32>, vector<32x128xf32>, vector<2x128xf32> -> vector<2x128xf32>
    %cst_23 = arith.constant dense<0.000000e+00> : vector<2x128xf32>
    %31 = tpu.matmul %11, %2, %cst_23 {dimension_numbers = #tpu.dot_dimension_numbers<[1], [0], [0], [1], [0, 0, 1, 1], [], []>} : vector<2x32xf32>, vector<32x128xf32>, vector<2x128xf32> -> vector<2x128xf32>
    %32 = arith.addf %30, %31 : vector<2x128xf32>
    %33 = arith.addf %32, %3 : vector<2x128xf32>
    %cst_24 = arith.constant 5.000000e-01 : f32
    %34 = vector.broadcast %cst_24 : f32 to vector<2x128xf32>
    %35 = arith.mulf %34, %29 : vector<2x128xf32>
    %36 = math.tanh %35 : vector<2x128xf32>
    %cst_25 = arith.constant 5.000000e-01 : f32
    %37 = vector.broadcast %cst_25 : f32 to vector<2x128xf32>
    %38 = arith.mulf %37, %36 : vector<2x128xf32>
    %cst_26 = arith.constant 5.000000e-01 : f32
    %39 = vector.broadcast %cst_26 : f32 to vector<2x128xf32>
    %40 = arith.addf %38, %39 : vector<2x128xf32>
    %41 = math.tanh %29 : vector<2x128xf32>
    %42 = vector.extract_strided_slice %40 {offsets = [0, 0], sizes = [2, 32], strides = [1, 1]} : vector<2x128xf32> to vector<2x32xf32>
    %43 = vector.extract_strided_slice %40 {offsets = [0, 32], sizes = [2, 32], strides = [1, 1]} : vector<2x128xf32> to vector<2x32xf32>
    %44 = vector.extract_strided_slice %41 {offsets = [0, 64], sizes = [2, 32], strides = [1, 1]} : vector<2x128xf32> to vector<2x32xf32>
    %45 = vector.extract_strided_slice %40 {offsets = [0, 96], sizes = [2, 32], strides = [1, 1]} : vector<2x128xf32> to vector<2x32xf32>
    %46 = arith.mulf %43, %24 : vector<2x32xf32>
    %47 = arith.mulf %42, %44 : vector<2x32xf32>
    %48 = arith.addf %46, %47 : vector<2x32xf32>
    %49 = math.tanh %48 : vector<2x32xf32>
    %50 = arith.mulf %45, %49 : vector<2x32xf32>
    %cst_27 = arith.constant 5.000000e-01 : f32
    %51 = vector.broadcast %cst_27 : f32 to vector<2x128xf32>
    %52 = arith.mulf %51, %33 : vector<2x128xf32>
    %53 = math.tanh %52 : vector<2x128xf32>
    %cst_28 = arith.constant 5.000000e-01 : f32
    %54 = vector.broadcast %cst_28 : f32 to vector<2x128xf32>
    %55 = arith.mulf %54, %53 : vector<2x128xf32>
    %cst_29 = arith.constant 5.000000e-01 : f32
    %56 = vector.broadcast %cst_29 : f32 to vector<2x128xf32>
    %57 = arith.addf %55, %56 : vector<2x128xf32>
    %58 = math.tanh %33 : vector<2x128xf32>
    %59 = vector.extract_strided_slice %57 {offsets = [0, 0], sizes = [2, 32], strides = [1, 1]} : vector<2x128xf32> to vector<2x32xf32>
    %60 = vector.extract_strided_slice %57 {offsets = [0, 32], sizes = [2, 32], strides = [1, 1]} : vector<2x128xf32> to vector<2x32xf32>
    %61 = vector.extract_strided_slice %58 {offsets = [0, 64], sizes = [2, 32], strides = [1, 1]} : vector<2x128xf32> to vector<2x32xf32>
    %62 = vector.extract_strided_slice %57 {offsets = [0, 96], sizes = [2, 32], strides = [1, 1]} : vector<2x128xf32> to vector<2x32xf32>
    %63 = arith.mulf %60, %11 : vector<2x32xf32>
    %64 = arith.mulf %59, %61 : vector<2x32xf32>
    %65 = arith.addf %63, %64 : vector<2x32xf32>
    %66 = math.tanh %65 : vector<2x32xf32>
    %67 = arith.mulf %62, %66 : vector<2x32xf32>
    %68 = vector.extract_strided_slice %10 {offsets = [4, 0], sizes = [2, 128], strides = [1, 1]} : vector<16x128xf32> to vector<2x128xf32>
    %cst_30 = arith.constant dense<0.000000e+00> : vector<2x128xf32>
    %69 = tpu.matmul %50, %0, %cst_30 {dimension_numbers = #tpu.dot_dimension_numbers<[1], [0], [0], [1], [0, 0, 1, 1], [], []>} : vector<2x32xf32>, vector<32x128xf32>, vector<2x128xf32> -> vector<2x128xf32>
    %70 = arith.addf %68, %69 : vector<2x128xf32>
    %cst_31 = arith.constant dense<0.000000e+00> : vector<2x128xf32>
    %71 = tpu.matmul %50, %1, %cst_31 {dimension_numbers = #tpu.dot_dimension_numbers<[1], [0], [0], [1], [0, 0, 1, 1], [], []>} : vector<2x32xf32>, vector<32x128xf32>, vector<2x128xf32> -> vector<2x128xf32>
    %cst_32 = arith.constant dense<0.000000e+00> : vector<2x128xf32>
    %72 = tpu.matmul %67, %2, %cst_32 {dimension_numbers = #tpu.dot_dimension_numbers<[1], [0], [0], [1], [0, 0, 1, 1], [], []>} : vector<2x32xf32>, vector<32x128xf32>, vector<2x128xf32> -> vector<2x128xf32>
    %73 = arith.addf %71, %72 : vector<2x128xf32>
    %74 = arith.addf %73, %3 : vector<2x128xf32>
    %cst_33 = arith.constant 5.000000e-01 : f32
    %75 = vector.broadcast %cst_33 : f32 to vector<2x128xf32>
    %76 = arith.mulf %75, %70 : vector<2x128xf32>
    %77 = math.tanh %76 : vector<2x128xf32>
    %cst_34 = arith.constant 5.000000e-01 : f32
    %78 = vector.broadcast %cst_34 : f32 to vector<2x128xf32>
    %79 = arith.mulf %78, %77 : vector<2x128xf32>
    %cst_35 = arith.constant 5.000000e-01 : f32
    %80 = vector.broadcast %cst_35 : f32 to vector<2x128xf32>
    %81 = arith.addf %79, %80 : vector<2x128xf32>
    %82 = math.tanh %70 : vector<2x128xf32>
    %83 = vector.extract_strided_slice %81 {offsets = [0, 0], sizes = [2, 32], strides = [1, 1]} : vector<2x128xf32> to vector<2x32xf32>
    %84 = vector.extract_strided_slice %81 {offsets = [0, 32], sizes = [2, 32], strides = [1, 1]} : vector<2x128xf32> to vector<2x32xf32>
    %85 = vector.extract_strided_slice %82 {offsets = [0, 64], sizes = [2, 32], strides = [1, 1]} : vector<2x128xf32> to vector<2x32xf32>
    %86 = vector.extract_strided_slice %81 {offsets = [0, 96], sizes = [2, 32], strides = [1, 1]} : vector<2x128xf32> to vector<2x32xf32>
    %87 = arith.mulf %84, %48 : vector<2x32xf32>
    %88 = arith.mulf %83, %85 : vector<2x32xf32>
    %89 = arith.addf %87, %88 : vector<2x32xf32>
    %90 = math.tanh %89 : vector<2x32xf32>
    %91 = arith.mulf %86, %90 : vector<2x32xf32>
    %cst_36 = arith.constant 5.000000e-01 : f32
    %92 = vector.broadcast %cst_36 : f32 to vector<2x128xf32>
    %93 = arith.mulf %92, %74 : vector<2x128xf32>
    %94 = math.tanh %93 : vector<2x128xf32>
    %cst_37 = arith.constant 5.000000e-01 : f32
    %95 = vector.broadcast %cst_37 : f32 to vector<2x128xf32>
    %96 = arith.mulf %95, %94 : vector<2x128xf32>
    %cst_38 = arith.constant 5.000000e-01 : f32
    %97 = vector.broadcast %cst_38 : f32 to vector<2x128xf32>
    %98 = arith.addf %96, %97 : vector<2x128xf32>
    %99 = math.tanh %74 : vector<2x128xf32>
    %100 = vector.extract_strided_slice %98 {offsets = [0, 0], sizes = [2, 32], strides = [1, 1]} : vector<2x128xf32> to vector<2x32xf32>
    %101 = vector.extract_strided_slice %98 {offsets = [0, 32], sizes = [2, 32], strides = [1, 1]} : vector<2x128xf32> to vector<2x32xf32>
    %102 = vector.extract_strided_slice %99 {offsets = [0, 64], sizes = [2, 32], strides = [1, 1]} : vector<2x128xf32> to vector<2x32xf32>
    %103 = vector.extract_strided_slice %98 {offsets = [0, 96], sizes = [2, 32], strides = [1, 1]} : vector<2x128xf32> to vector<2x32xf32>
    %104 = arith.mulf %101, %65 : vector<2x32xf32>
    %105 = arith.mulf %100, %102 : vector<2x32xf32>
    %106 = arith.addf %104, %105 : vector<2x32xf32>
    %107 = math.tanh %106 : vector<2x32xf32>
    %108 = arith.mulf %103, %107 : vector<2x32xf32>
    %109 = vector.extract_strided_slice %10 {offsets = [6, 0], sizes = [2, 128], strides = [1, 1]} : vector<16x128xf32> to vector<2x128xf32>
    %cst_39 = arith.constant dense<0.000000e+00> : vector<2x128xf32>
    %110 = tpu.matmul %91, %0, %cst_39 {dimension_numbers = #tpu.dot_dimension_numbers<[1], [0], [0], [1], [0, 0, 1, 1], [], []>} : vector<2x32xf32>, vector<32x128xf32>, vector<2x128xf32> -> vector<2x128xf32>
    %111 = arith.addf %109, %110 : vector<2x128xf32>
    %cst_40 = arith.constant dense<0.000000e+00> : vector<2x128xf32>
    %112 = tpu.matmul %91, %1, %cst_40 {dimension_numbers = #tpu.dot_dimension_numbers<[1], [0], [0], [1], [0, 0, 1, 1], [], []>} : vector<2x32xf32>, vector<32x128xf32>, vector<2x128xf32> -> vector<2x128xf32>
    %cst_41 = arith.constant dense<0.000000e+00> : vector<2x128xf32>
    %113 = tpu.matmul %108, %2, %cst_41 {dimension_numbers = #tpu.dot_dimension_numbers<[1], [0], [0], [1], [0, 0, 1, 1], [], []>} : vector<2x32xf32>, vector<32x128xf32>, vector<2x128xf32> -> vector<2x128xf32>
    %114 = arith.addf %112, %113 : vector<2x128xf32>
    %115 = arith.addf %114, %3 : vector<2x128xf32>
    %cst_42 = arith.constant 5.000000e-01 : f32
    %116 = vector.broadcast %cst_42 : f32 to vector<2x128xf32>
    %117 = arith.mulf %116, %111 : vector<2x128xf32>
    %118 = math.tanh %117 : vector<2x128xf32>
    %cst_43 = arith.constant 5.000000e-01 : f32
    %119 = vector.broadcast %cst_43 : f32 to vector<2x128xf32>
    %120 = arith.mulf %119, %118 : vector<2x128xf32>
    %cst_44 = arith.constant 5.000000e-01 : f32
    %121 = vector.broadcast %cst_44 : f32 to vector<2x128xf32>
    %122 = arith.addf %120, %121 : vector<2x128xf32>
    %123 = math.tanh %111 : vector<2x128xf32>
    %124 = vector.extract_strided_slice %122 {offsets = [0, 0], sizes = [2, 32], strides = [1, 1]} : vector<2x128xf32> to vector<2x32xf32>
    %125 = vector.extract_strided_slice %122 {offsets = [0, 32], sizes = [2, 32], strides = [1, 1]} : vector<2x128xf32> to vector<2x32xf32>
    %126 = vector.extract_strided_slice %123 {offsets = [0, 64], sizes = [2, 32], strides = [1, 1]} : vector<2x128xf32> to vector<2x32xf32>
    %127 = vector.extract_strided_slice %122 {offsets = [0, 96], sizes = [2, 32], strides = [1, 1]} : vector<2x128xf32> to vector<2x32xf32>
    %128 = arith.mulf %125, %89 : vector<2x32xf32>
    %129 = arith.mulf %124, %126 : vector<2x32xf32>
    %130 = arith.addf %128, %129 : vector<2x32xf32>
    %131 = math.tanh %130 : vector<2x32xf32>
    %132 = arith.mulf %127, %131 : vector<2x32xf32>
    %cst_45 = arith.constant 5.000000e-01 : f32
    %133 = vector.broadcast %cst_45 : f32 to vector<2x128xf32>
    %134 = arith.mulf %133, %115 : vector<2x128xf32>
    %135 = math.tanh %134 : vector<2x128xf32>
    %cst_46 = arith.constant 5.000000e-01 : f32
    %136 = vector.broadcast %cst_46 : f32 to vector<2x128xf32>
    %137 = arith.mulf %136, %135 : vector<2x128xf32>
    %cst_47 = arith.constant 5.000000e-01 : f32
    %138 = vector.broadcast %cst_47 : f32 to vector<2x128xf32>
    %139 = arith.addf %137, %138 : vector<2x128xf32>
    %140 = math.tanh %115 : vector<2x128xf32>
    %141 = vector.extract_strided_slice %139 {offsets = [0, 0], sizes = [2, 32], strides = [1, 1]} : vector<2x128xf32> to vector<2x32xf32>
    %142 = vector.extract_strided_slice %139 {offsets = [0, 32], sizes = [2, 32], strides = [1, 1]} : vector<2x128xf32> to vector<2x32xf32>
    %143 = vector.extract_strided_slice %140 {offsets = [0, 64], sizes = [2, 32], strides = [1, 1]} : vector<2x128xf32> to vector<2x32xf32>
    %144 = vector.extract_strided_slice %139 {offsets = [0, 96], sizes = [2, 32], strides = [1, 1]} : vector<2x128xf32> to vector<2x32xf32>
    %145 = arith.mulf %142, %106 : vector<2x32xf32>
    %146 = arith.mulf %141, %143 : vector<2x32xf32>
    %147 = arith.addf %145, %146 : vector<2x32xf32>
    %148 = math.tanh %147 : vector<2x32xf32>
    %149 = arith.mulf %144, %148 : vector<2x32xf32>
    %150 = vector.extract_strided_slice %10 {offsets = [8, 0], sizes = [2, 128], strides = [1, 1]} : vector<16x128xf32> to vector<2x128xf32>
    %cst_48 = arith.constant dense<0.000000e+00> : vector<2x128xf32>
    %151 = tpu.matmul %132, %0, %cst_48 {dimension_numbers = #tpu.dot_dimension_numbers<[1], [0], [0], [1], [0, 0, 1, 1], [], []>} : vector<2x32xf32>, vector<32x128xf32>, vector<2x128xf32> -> vector<2x128xf32>
    %152 = arith.addf %150, %151 : vector<2x128xf32>
    %cst_49 = arith.constant dense<0.000000e+00> : vector<2x128xf32>
    %153 = tpu.matmul %132, %1, %cst_49 {dimension_numbers = #tpu.dot_dimension_numbers<[1], [0], [0], [1], [0, 0, 1, 1], [], []>} : vector<2x32xf32>, vector<32x128xf32>, vector<2x128xf32> -> vector<2x128xf32>
    %cst_50 = arith.constant dense<0.000000e+00> : vector<2x128xf32>
    %154 = tpu.matmul %149, %2, %cst_50 {dimension_numbers = #tpu.dot_dimension_numbers<[1], [0], [0], [1], [0, 0, 1, 1], [], []>} : vector<2x32xf32>, vector<32x128xf32>, vector<2x128xf32> -> vector<2x128xf32>
    %155 = arith.addf %153, %154 : vector<2x128xf32>
    %156 = arith.addf %155, %3 : vector<2x128xf32>
    %cst_51 = arith.constant 5.000000e-01 : f32
    %157 = vector.broadcast %cst_51 : f32 to vector<2x128xf32>
    %158 = arith.mulf %157, %152 : vector<2x128xf32>
    %159 = math.tanh %158 : vector<2x128xf32>
    %cst_52 = arith.constant 5.000000e-01 : f32
    %160 = vector.broadcast %cst_52 : f32 to vector<2x128xf32>
    %161 = arith.mulf %160, %159 : vector<2x128xf32>
    %cst_53 = arith.constant 5.000000e-01 : f32
    %162 = vector.broadcast %cst_53 : f32 to vector<2x128xf32>
    %163 = arith.addf %161, %162 : vector<2x128xf32>
    %164 = math.tanh %152 : vector<2x128xf32>
    %165 = vector.extract_strided_slice %163 {offsets = [0, 0], sizes = [2, 32], strides = [1, 1]} : vector<2x128xf32> to vector<2x32xf32>
    %166 = vector.extract_strided_slice %163 {offsets = [0, 32], sizes = [2, 32], strides = [1, 1]} : vector<2x128xf32> to vector<2x32xf32>
    %167 = vector.extract_strided_slice %164 {offsets = [0, 64], sizes = [2, 32], strides = [1, 1]} : vector<2x128xf32> to vector<2x32xf32>
    %168 = vector.extract_strided_slice %163 {offsets = [0, 96], sizes = [2, 32], strides = [1, 1]} : vector<2x128xf32> to vector<2x32xf32>
    %169 = arith.mulf %166, %130 : vector<2x32xf32>
    %170 = arith.mulf %165, %167 : vector<2x32xf32>
    %171 = arith.addf %169, %170 : vector<2x32xf32>
    %172 = math.tanh %171 : vector<2x32xf32>
    %173 = arith.mulf %168, %172 : vector<2x32xf32>
    %cst_54 = arith.constant 5.000000e-01 : f32
    %174 = vector.broadcast %cst_54 : f32 to vector<2x128xf32>
    %175 = arith.mulf %174, %156 : vector<2x128xf32>
    %176 = math.tanh %175 : vector<2x128xf32>
    %cst_55 = arith.constant 5.000000e-01 : f32
    %177 = vector.broadcast %cst_55 : f32 to vector<2x128xf32>
    %178 = arith.mulf %177, %176 : vector<2x128xf32>
    %cst_56 = arith.constant 5.000000e-01 : f32
    %179 = vector.broadcast %cst_56 : f32 to vector<2x128xf32>
    %180 = arith.addf %178, %179 : vector<2x128xf32>
    %181 = math.tanh %156 : vector<2x128xf32>
    %182 = vector.extract_strided_slice %180 {offsets = [0, 0], sizes = [2, 32], strides = [1, 1]} : vector<2x128xf32> to vector<2x32xf32>
    %183 = vector.extract_strided_slice %180 {offsets = [0, 32], sizes = [2, 32], strides = [1, 1]} : vector<2x128xf32> to vector<2x32xf32>
    %184 = vector.extract_strided_slice %181 {offsets = [0, 64], sizes = [2, 32], strides = [1, 1]} : vector<2x128xf32> to vector<2x32xf32>
    %185 = vector.extract_strided_slice %180 {offsets = [0, 96], sizes = [2, 32], strides = [1, 1]} : vector<2x128xf32> to vector<2x32xf32>
    %186 = arith.mulf %183, %147 : vector<2x32xf32>
    %187 = arith.mulf %182, %184 : vector<2x32xf32>
    %188 = arith.addf %186, %187 : vector<2x32xf32>
    %189 = math.tanh %188 : vector<2x32xf32>
    %190 = arith.mulf %185, %189 : vector<2x32xf32>
    %191 = vector.extract_strided_slice %10 {offsets = [10, 0], sizes = [2, 128], strides = [1, 1]} : vector<16x128xf32> to vector<2x128xf32>
    %cst_57 = arith.constant dense<0.000000e+00> : vector<2x128xf32>
    %192 = tpu.matmul %173, %0, %cst_57 {dimension_numbers = #tpu.dot_dimension_numbers<[1], [0], [0], [1], [0, 0, 1, 1], [], []>} : vector<2x32xf32>, vector<32x128xf32>, vector<2x128xf32> -> vector<2x128xf32>
    %193 = arith.addf %191, %192 : vector<2x128xf32>
    %cst_58 = arith.constant dense<0.000000e+00> : vector<2x128xf32>
    %194 = tpu.matmul %173, %1, %cst_58 {dimension_numbers = #tpu.dot_dimension_numbers<[1], [0], [0], [1], [0, 0, 1, 1], [], []>} : vector<2x32xf32>, vector<32x128xf32>, vector<2x128xf32> -> vector<2x128xf32>
    %cst_59 = arith.constant dense<0.000000e+00> : vector<2x128xf32>
    %195 = tpu.matmul %190, %2, %cst_59 {dimension_numbers = #tpu.dot_dimension_numbers<[1], [0], [0], [1], [0, 0, 1, 1], [], []>} : vector<2x32xf32>, vector<32x128xf32>, vector<2x128xf32> -> vector<2x128xf32>
    %196 = arith.addf %194, %195 : vector<2x128xf32>
    %197 = arith.addf %196, %3 : vector<2x128xf32>
    %cst_60 = arith.constant 5.000000e-01 : f32
    %198 = vector.broadcast %cst_60 : f32 to vector<2x128xf32>
    %199 = arith.mulf %198, %193 : vector<2x128xf32>
    %200 = math.tanh %199 : vector<2x128xf32>
    %cst_61 = arith.constant 5.000000e-01 : f32
    %201 = vector.broadcast %cst_61 : f32 to vector<2x128xf32>
    %202 = arith.mulf %201, %200 : vector<2x128xf32>
    %cst_62 = arith.constant 5.000000e-01 : f32
    %203 = vector.broadcast %cst_62 : f32 to vector<2x128xf32>
    %204 = arith.addf %202, %203 : vector<2x128xf32>
    %205 = math.tanh %193 : vector<2x128xf32>
    %206 = vector.extract_strided_slice %204 {offsets = [0, 0], sizes = [2, 32], strides = [1, 1]} : vector<2x128xf32> to vector<2x32xf32>
    %207 = vector.extract_strided_slice %204 {offsets = [0, 32], sizes = [2, 32], strides = [1, 1]} : vector<2x128xf32> to vector<2x32xf32>
    %208 = vector.extract_strided_slice %205 {offsets = [0, 64], sizes = [2, 32], strides = [1, 1]} : vector<2x128xf32> to vector<2x32xf32>
    %209 = vector.extract_strided_slice %204 {offsets = [0, 96], sizes = [2, 32], strides = [1, 1]} : vector<2x128xf32> to vector<2x32xf32>
    %210 = arith.mulf %207, %171 : vector<2x32xf32>
    %211 = arith.mulf %206, %208 : vector<2x32xf32>
    %212 = arith.addf %210, %211 : vector<2x32xf32>
    %213 = math.tanh %212 : vector<2x32xf32>
    %214 = arith.mulf %209, %213 : vector<2x32xf32>
    %cst_63 = arith.constant 5.000000e-01 : f32
    %215 = vector.broadcast %cst_63 : f32 to vector<2x128xf32>
    %216 = arith.mulf %215, %197 : vector<2x128xf32>
    %217 = math.tanh %216 : vector<2x128xf32>
    %cst_64 = arith.constant 5.000000e-01 : f32
    %218 = vector.broadcast %cst_64 : f32 to vector<2x128xf32>
    %219 = arith.mulf %218, %217 : vector<2x128xf32>
    %cst_65 = arith.constant 5.000000e-01 : f32
    %220 = vector.broadcast %cst_65 : f32 to vector<2x128xf32>
    %221 = arith.addf %219, %220 : vector<2x128xf32>
    %222 = math.tanh %197 : vector<2x128xf32>
    %223 = vector.extract_strided_slice %221 {offsets = [0, 0], sizes = [2, 32], strides = [1, 1]} : vector<2x128xf32> to vector<2x32xf32>
    %224 = vector.extract_strided_slice %221 {offsets = [0, 32], sizes = [2, 32], strides = [1, 1]} : vector<2x128xf32> to vector<2x32xf32>
    %225 = vector.extract_strided_slice %222 {offsets = [0, 64], sizes = [2, 32], strides = [1, 1]} : vector<2x128xf32> to vector<2x32xf32>
    %226 = vector.extract_strided_slice %221 {offsets = [0, 96], sizes = [2, 32], strides = [1, 1]} : vector<2x128xf32> to vector<2x32xf32>
    %227 = arith.mulf %224, %188 : vector<2x32xf32>
    %228 = arith.mulf %223, %225 : vector<2x32xf32>
    %229 = arith.addf %227, %228 : vector<2x32xf32>
    %230 = math.tanh %229 : vector<2x32xf32>
    %231 = arith.mulf %226, %230 : vector<2x32xf32>
    %232 = vector.extract_strided_slice %10 {offsets = [12, 0], sizes = [2, 128], strides = [1, 1]} : vector<16x128xf32> to vector<2x128xf32>
    %cst_66 = arith.constant dense<0.000000e+00> : vector<2x128xf32>
    %233 = tpu.matmul %214, %0, %cst_66 {dimension_numbers = #tpu.dot_dimension_numbers<[1], [0], [0], [1], [0, 0, 1, 1], [], []>} : vector<2x32xf32>, vector<32x128xf32>, vector<2x128xf32> -> vector<2x128xf32>
    %234 = arith.addf %232, %233 : vector<2x128xf32>
    %cst_67 = arith.constant dense<0.000000e+00> : vector<2x128xf32>
    %235 = tpu.matmul %214, %1, %cst_67 {dimension_numbers = #tpu.dot_dimension_numbers<[1], [0], [0], [1], [0, 0, 1, 1], [], []>} : vector<2x32xf32>, vector<32x128xf32>, vector<2x128xf32> -> vector<2x128xf32>
    %cst_68 = arith.constant dense<0.000000e+00> : vector<2x128xf32>
    %236 = tpu.matmul %231, %2, %cst_68 {dimension_numbers = #tpu.dot_dimension_numbers<[1], [0], [0], [1], [0, 0, 1, 1], [], []>} : vector<2x32xf32>, vector<32x128xf32>, vector<2x128xf32> -> vector<2x128xf32>
    %237 = arith.addf %235, %236 : vector<2x128xf32>
    %238 = arith.addf %237, %3 : vector<2x128xf32>
    %cst_69 = arith.constant 5.000000e-01 : f32
    %239 = vector.broadcast %cst_69 : f32 to vector<2x128xf32>
    %240 = arith.mulf %239, %234 : vector<2x128xf32>
    %241 = math.tanh %240 : vector<2x128xf32>
    %cst_70 = arith.constant 5.000000e-01 : f32
    %242 = vector.broadcast %cst_70 : f32 to vector<2x128xf32>
    %243 = arith.mulf %242, %241 : vector<2x128xf32>
    %cst_71 = arith.constant 5.000000e-01 : f32
    %244 = vector.broadcast %cst_71 : f32 to vector<2x128xf32>
    %245 = arith.addf %243, %244 : vector<2x128xf32>
    %246 = math.tanh %234 : vector<2x128xf32>
    %247 = vector.extract_strided_slice %245 {offsets = [0, 0], sizes = [2, 32], strides = [1, 1]} : vector<2x128xf32> to vector<2x32xf32>
    %248 = vector.extract_strided_slice %245 {offsets = [0, 32], sizes = [2, 32], strides = [1, 1]} : vector<2x128xf32> to vector<2x32xf32>
    %249 = vector.extract_strided_slice %246 {offsets = [0, 64], sizes = [2, 32], strides = [1, 1]} : vector<2x128xf32> to vector<2x32xf32>
    %250 = vector.extract_strided_slice %245 {offsets = [0, 96], sizes = [2, 32], strides = [1, 1]} : vector<2x128xf32> to vector<2x32xf32>
    %251 = arith.mulf %248, %212 : vector<2x32xf32>
    %252 = arith.mulf %247, %249 : vector<2x32xf32>
    %253 = arith.addf %251, %252 : vector<2x32xf32>
    %254 = math.tanh %253 : vector<2x32xf32>
    %255 = arith.mulf %250, %254 : vector<2x32xf32>
    %cst_72 = arith.constant 5.000000e-01 : f32
    %256 = vector.broadcast %cst_72 : f32 to vector<2x128xf32>
    %257 = arith.mulf %256, %238 : vector<2x128xf32>
    %258 = math.tanh %257 : vector<2x128xf32>
    %cst_73 = arith.constant 5.000000e-01 : f32
    %259 = vector.broadcast %cst_73 : f32 to vector<2x128xf32>
    %260 = arith.mulf %259, %258 : vector<2x128xf32>
    %cst_74 = arith.constant 5.000000e-01 : f32
    %261 = vector.broadcast %cst_74 : f32 to vector<2x128xf32>
    %262 = arith.addf %260, %261 : vector<2x128xf32>
    %263 = math.tanh %238 : vector<2x128xf32>
    %264 = vector.extract_strided_slice %262 {offsets = [0, 0], sizes = [2, 32], strides = [1, 1]} : vector<2x128xf32> to vector<2x32xf32>
    %265 = vector.extract_strided_slice %262 {offsets = [0, 32], sizes = [2, 32], strides = [1, 1]} : vector<2x128xf32> to vector<2x32xf32>
    %266 = vector.extract_strided_slice %263 {offsets = [0, 64], sizes = [2, 32], strides = [1, 1]} : vector<2x128xf32> to vector<2x32xf32>
    %267 = vector.extract_strided_slice %262 {offsets = [0, 96], sizes = [2, 32], strides = [1, 1]} : vector<2x128xf32> to vector<2x32xf32>
    %268 = arith.mulf %265, %229 : vector<2x32xf32>
    %269 = arith.mulf %264, %266 : vector<2x32xf32>
    %270 = arith.addf %268, %269 : vector<2x32xf32>
    %271 = math.tanh %270 : vector<2x32xf32>
    %272 = arith.mulf %267, %271 : vector<2x32xf32>
    %273 = vector.extract_strided_slice %10 {offsets = [14, 0], sizes = [2, 128], strides = [1, 1]} : vector<16x128xf32> to vector<2x128xf32>
    %cst_75 = arith.constant dense<0.000000e+00> : vector<2x128xf32>
    %274 = tpu.matmul %255, %0, %cst_75 {dimension_numbers = #tpu.dot_dimension_numbers<[1], [0], [0], [1], [0, 0, 1, 1], [], []>} : vector<2x32xf32>, vector<32x128xf32>, vector<2x128xf32> -> vector<2x128xf32>
    %275 = arith.addf %273, %274 : vector<2x128xf32>
    %cst_76 = arith.constant dense<0.000000e+00> : vector<2x128xf32>
    %276 = tpu.matmul %255, %1, %cst_76 {dimension_numbers = #tpu.dot_dimension_numbers<[1], [0], [0], [1], [0, 0, 1, 1], [], []>} : vector<2x32xf32>, vector<32x128xf32>, vector<2x128xf32> -> vector<2x128xf32>
    %cst_77 = arith.constant dense<0.000000e+00> : vector<2x128xf32>
    %277 = tpu.matmul %272, %2, %cst_77 {dimension_numbers = #tpu.dot_dimension_numbers<[1], [0], [0], [1], [0, 0, 1, 1], [], []>} : vector<2x32xf32>, vector<32x128xf32>, vector<2x128xf32> -> vector<2x128xf32>
    %278 = arith.addf %276, %277 : vector<2x128xf32>
    %279 = arith.addf %278, %3 : vector<2x128xf32>
    %cst_78 = arith.constant 5.000000e-01 : f32
    %280 = vector.broadcast %cst_78 : f32 to vector<2x128xf32>
    %281 = arith.mulf %280, %275 : vector<2x128xf32>
    %282 = math.tanh %281 : vector<2x128xf32>
    %cst_79 = arith.constant 5.000000e-01 : f32
    %283 = vector.broadcast %cst_79 : f32 to vector<2x128xf32>
    %284 = arith.mulf %283, %282 : vector<2x128xf32>
    %cst_80 = arith.constant 5.000000e-01 : f32
    %285 = vector.broadcast %cst_80 : f32 to vector<2x128xf32>
    %286 = arith.addf %284, %285 : vector<2x128xf32>
    %287 = math.tanh %275 : vector<2x128xf32>
    %288 = vector.extract_strided_slice %286 {offsets = [0, 0], sizes = [2, 32], strides = [1, 1]} : vector<2x128xf32> to vector<2x32xf32>
    %289 = vector.extract_strided_slice %286 {offsets = [0, 32], sizes = [2, 32], strides = [1, 1]} : vector<2x128xf32> to vector<2x32xf32>
    %290 = vector.extract_strided_slice %287 {offsets = [0, 64], sizes = [2, 32], strides = [1, 1]} : vector<2x128xf32> to vector<2x32xf32>
    %291 = vector.extract_strided_slice %286 {offsets = [0, 96], sizes = [2, 32], strides = [1, 1]} : vector<2x128xf32> to vector<2x32xf32>
    %292 = arith.mulf %289, %253 : vector<2x32xf32>
    %293 = arith.mulf %288, %290 : vector<2x32xf32>
    %294 = arith.addf %292, %293 : vector<2x32xf32>
    %295 = math.tanh %294 : vector<2x32xf32>
    %296 = arith.mulf %291, %295 : vector<2x32xf32>
    %cst_81 = arith.constant 5.000000e-01 : f32
    %297 = vector.broadcast %cst_81 : f32 to vector<2x128xf32>
    %298 = arith.mulf %297, %279 : vector<2x128xf32>
    %299 = math.tanh %298 : vector<2x128xf32>
    %cst_82 = arith.constant 5.000000e-01 : f32
    %300 = vector.broadcast %cst_82 : f32 to vector<2x128xf32>
    %301 = arith.mulf %300, %299 : vector<2x128xf32>
    %cst_83 = arith.constant 5.000000e-01 : f32
    %302 = vector.broadcast %cst_83 : f32 to vector<2x128xf32>
    %303 = arith.addf %301, %302 : vector<2x128xf32>
    %304 = math.tanh %279 : vector<2x128xf32>
    %305 = vector.extract_strided_slice %303 {offsets = [0, 0], sizes = [2, 32], strides = [1, 1]} : vector<2x128xf32> to vector<2x32xf32>
    %306 = vector.extract_strided_slice %303 {offsets = [0, 32], sizes = [2, 32], strides = [1, 1]} : vector<2x128xf32> to vector<2x32xf32>
    %307 = vector.extract_strided_slice %304 {offsets = [0, 64], sizes = [2, 32], strides = [1, 1]} : vector<2x128xf32> to vector<2x32xf32>
    %308 = vector.extract_strided_slice %303 {offsets = [0, 96], sizes = [2, 32], strides = [1, 1]} : vector<2x128xf32> to vector<2x32xf32>
    %309 = arith.mulf %306, %270 : vector<2x32xf32>
    %310 = arith.mulf %305, %307 : vector<2x32xf32>
    %311 = arith.addf %309, %310 : vector<2x32xf32>
    %312 = math.tanh %311 : vector<2x32xf32>
    %313 = arith.mulf %308, %312 : vector<2x32xf32>
    %cst_84 = arith.constant dense<0.000000e+00> : vector<2x128xf32>
    %314 = tpu.matmul %296, %1, %cst_84 {dimension_numbers = #tpu.dot_dimension_numbers<[1], [0], [0], [1], [0, 0, 1, 1], [], []>} : vector<2x32xf32>, vector<32x128xf32>, vector<2x128xf32> -> vector<2x128xf32>
    %cst_85 = arith.constant dense<0.000000e+00> : vector<2x128xf32>
    %315 = tpu.matmul %313, %2, %cst_85 {dimension_numbers = #tpu.dot_dimension_numbers<[1], [0], [0], [1], [0, 0, 1, 1], [], []>} : vector<2x32xf32>, vector<32x128xf32>, vector<2x128xf32> -> vector<2x128xf32>
    %316 = arith.addf %314, %315 : vector<2x128xf32>
    %317 = arith.addf %316, %3 : vector<2x128xf32>
    %cst_86 = arith.constant 5.000000e-01 : f32
    %318 = vector.broadcast %cst_86 : f32 to vector<2x128xf32>
    %319 = arith.mulf %318, %317 : vector<2x128xf32>
    %320 = math.tanh %319 : vector<2x128xf32>
    %cst_87 = arith.constant 5.000000e-01 : f32
    %321 = vector.broadcast %cst_87 : f32 to vector<2x128xf32>
    %322 = arith.mulf %321, %320 : vector<2x128xf32>
    %cst_88 = arith.constant 5.000000e-01 : f32
    %323 = vector.broadcast %cst_88 : f32 to vector<2x128xf32>
    %324 = arith.addf %322, %323 : vector<2x128xf32>
    %325 = math.tanh %317 : vector<2x128xf32>
    %326 = vector.extract_strided_slice %324 {offsets = [0, 0], sizes = [2, 32], strides = [1, 1]} : vector<2x128xf32> to vector<2x32xf32>
    %327 = vector.extract_strided_slice %324 {offsets = [0, 32], sizes = [2, 32], strides = [1, 1]} : vector<2x128xf32> to vector<2x32xf32>
    %328 = vector.extract_strided_slice %325 {offsets = [0, 64], sizes = [2, 32], strides = [1, 1]} : vector<2x128xf32> to vector<2x32xf32>
    %329 = vector.extract_strided_slice %324 {offsets = [0, 96], sizes = [2, 32], strides = [1, 1]} : vector<2x128xf32> to vector<2x32xf32>
    %330 = arith.mulf %327, %311 : vector<2x32xf32>
    %331 = arith.mulf %326, %328 : vector<2x32xf32>
    %332 = arith.addf %330, %331 : vector<2x32xf32>
    %333 = math.tanh %332 : vector<2x32xf32>
    %334 = arith.mulf %329, %333 : vector<2x32xf32>
    %335 = tpu.concatenate %67, %108, %149, %190, %231, %272, %313, %334 in 0 : vector<2x32xf32>, vector<2x32xf32>, vector<2x32xf32>, vector<2x32xf32>, vector<2x32xf32>, vector<2x32xf32>, vector<2x32xf32>, vector<2x32xf32> -> vector<16x32xf32>
    %cst_89 = arith.constant dense<0.000000e+00> : vector<16x16xf32>
    %336 = tpu.matmul %335, %4, %cst_89 {dimension_numbers = #tpu.dot_dimension_numbers<[1], [0], [0], [1], [0, 0, 1, 1], [], []>} : vector<16x32xf32>, vector<32x16xf32>, vector<16x16xf32> -> vector<16x16xf32>
    %337 = arith.addf %336, %5 : vector<16x16xf32>
    %cst_90 = arith.constant 0.000000e+00 : f32
    %338 = vector.broadcast %cst_90 : f32 to vector<16x16xf32>
    %339 = arith.maximumf %337, %338 : vector<16x16xf32>
    %340 = vector.extract_strided_slice %339 {offsets = [0, 0], sizes = [2, 16], strides = [1, 1]} : vector<16x16xf32> to vector<2x16xf32>
    %341 = vector.extract_strided_slice %339 {offsets = [2, 0], sizes = [2, 16], strides = [1, 1]} : vector<16x16xf32> to vector<2x16xf32>
    %342 = arith.addf %340, %341 : vector<2x16xf32>
    %343 = vector.extract_strided_slice %339 {offsets = [4, 0], sizes = [2, 16], strides = [1, 1]} : vector<16x16xf32> to vector<2x16xf32>
    %344 = arith.addf %342, %343 : vector<2x16xf32>
    %345 = vector.extract_strided_slice %339 {offsets = [6, 0], sizes = [2, 16], strides = [1, 1]} : vector<16x16xf32> to vector<2x16xf32>
    %346 = arith.addf %344, %345 : vector<2x16xf32>
    %347 = vector.extract_strided_slice %339 {offsets = [8, 0], sizes = [2, 16], strides = [1, 1]} : vector<16x16xf32> to vector<2x16xf32>
    %348 = arith.addf %346, %347 : vector<2x16xf32>
    %349 = vector.extract_strided_slice %339 {offsets = [10, 0], sizes = [2, 16], strides = [1, 1]} : vector<16x16xf32> to vector<2x16xf32>
    %350 = arith.addf %348, %349 : vector<2x16xf32>
    %351 = vector.extract_strided_slice %339 {offsets = [12, 0], sizes = [2, 16], strides = [1, 1]} : vector<16x16xf32> to vector<2x16xf32>
    %352 = arith.addf %350, %351 : vector<2x16xf32>
    %353 = vector.extract_strided_slice %339 {offsets = [14, 0], sizes = [2, 16], strides = [1, 1]} : vector<16x16xf32> to vector<2x16xf32>
    %354 = arith.addf %352, %353 : vector<2x16xf32>
    %cst_91 = arith.constant 1.250000e-01 : f32
    %355 = vector.broadcast %cst_91 : f32 to vector<2x16xf32>
    %356 = arith.mulf %354, %355 : vector<2x16xf32>
    %c0_92 = arith.constant 0 : index
    %c0_93 = arith.constant 0 : index
    %357 = vector.load %arg9[%c0_92, %c0_93] : memref<2x16xf32, #tpu.memory_space<vmem>>, vector<2x16xf32>
    tpu.vector_store %arg9[%c0_92, %c0_93], %356 {strides = array<i32>} : memref<2x16xf32, #tpu.memory_space<vmem>>, vector<2x16xf32>,
    return
  }
}

</mosaic_0001>

<bundles_post_ra>
// kernel: tpu_custom_call.1
= control target key start
LH: loop header
LB: loop body
LE: loop exit
PB: predicated region body
PF: predicated region fallthrough
CT: control target
= control target key end

     0   :  { %14 = vsyncpa [#allocation3], 0  ;;  %s3826_s0 = inlined_call_operand.hbm [shape: f32[16,16], index: 0, kind: input, shape index: {}]   ;;  %s3827_s1 = inlined_call_operand.hbm [shape: f32[16,128], index: 1, kind: input, shape index: {}]   ;;  %s3828_s2 = inlined_call_operand.vmem [shape: f32[32,128], index: 2, kind: input, shape index: {}]   ;;  %s3829_s3 = inlined_call_operand.hbm [shape: f32[16,128], index: 3, kind: input, shape index: {}]   ;;  %s3830_s4 = inlined_call_operand.hbm [shape: f32[32,128], index: 4, kind: input, shape index: {}]   ;;  %s3831_s5 = inlined_call_operand.vmem [shape: f32[32,128], index: 5, kind: input, shape index: {}]   ;;  %s3832_s6 = inlined_call_operand.vmem [shape: f32[2,128], index: 6, kind: input, shape index: {}]   ;;  %s3833_s7 = inlined_call_operand.vmem [shape: f32[32,16], index: 7, kind: input, shape index: {}]   ;;  %s3834_s8 = inlined_call_operand.hbm [shape: f32[16,16], index: 8, kind: input, shape index: {}]   ;;  %s3835_s9 = inlined_call_operand.hbm [shape: f32[2,16], index: 9, kind: output, shape index: {}]  }
   0x1   :  { %15 = vsyncpa [#allocation6], 0 }
   0x2   :  { %16 = vsyncpa [#allocation9], 0 }
   0x3   :  { %17 = vsyncpa [#allocation4], 0  ;;  %s3277_s30 = smov [#allocation5]   ;;  %s3278_s11 = smov [#allocation8]  }
   0x4   :  { %s35_s10 = sshll.u32 %s3277_s30, 4  ;;  %s61_s12 = sshll.u32 %s3278_s11, 4  ;;  %s36_s10 = int_to_ptr.vmem [resolvable:$true] %s35_s10  ;;  %s3341_s12 = int_to_ptr.vmem [resolvable:$true] %s61_s12 }
   0x5   :  { %s3137_s15 = scalar_lea.hbm %s3827_s1, 256 }
   0x6   :  { %p3138_p0 = scmp.ne.s32.totalorder %s3827_s1, %s3137_s15  ;;  %p3141_p1 = scmp.lt.u32.totalorder %s3137_s15, %s3827_s1 }
   0x8   :  { %p3143_p2 = pnand %p3141_p1, %p3138_p0 }
   0xa   :  { %3146 = shalt.err (!%p3143_p2)
}
   0xb   :  { %s3147_s20 = scalar_lea.vmem %s36_s10, 256  ;;  %p3152_p4 = scmp.lt.s32.totalorder %s36_s10, %s36_s10 }
   0xc   :  { %p3148_p3 = scmp.ne.s32.totalorder %s36_s10, %s3147_s20  ;;  %p3153_p5 = scmp.lt.s32.totalorder %s3147_s20, %s3147_s20 }
   0xe   :  { %p3154_p6 = por %p3153_p5, %p3152_p4 }
  0x10   :  { %p3155_p7 = pnand %p3154_p6, %p3148_p3 }
  0x12   :  { %3158 = shalt.err (!%p3155_p7)
}
  0x13   :  { %s3279_s21 = smov 128   ;;  %s3280_s22 = smov 8  }
  0x14   :  { %41 = dma.hbm_to_vmem [thread:$0]  %s3827_s1, 256, %s36_s10, [#allocation6], %s3279_s21, %s3279_s21, %s3280_s22  }
  0x15   :  { %s3159_s27 = scalar_lea.hbm %s3830_s4, 512 }
  0x16   :  { %p3160_p8 = scmp.ne.s32.totalorder %s3830_s4, %s3159_s27  ;;  %p3163_p9 = scmp.lt.u32.totalorder %s3159_s27, %s3830_s4 }
  0x18   :  { %p3165_p10 = pnand %p3163_p9, %p3160_p8 }
  0x1a   :  { %3168 = shalt.err (!%p3165_p10)
}
  0x1b   :  { %s3169_s13 = scalar_lea.vmem %s3341_s12, 512  ;;  %p3174_p12 = scmp.lt.s32.totalorder %s3341_s12, %s3341_s12 }
  0x1c   :  { %p3170_p11 = scmp.ne.s32.totalorder %s3341_s12, %s3169_s13  ;;  %p3175_p13 = scmp.lt.s32.totalorder %s3169_s13, %s3169_s13 }
  0x1e   :  { %p3176_p0 = por %p3175_p13, %p3174_p12 }
  0x20   :  { %p3177_p1 = pnand %p3176_p0, %p3170_p11 }
  0x22   :  { %3180 = shalt.err (!%p3177_p1)
}
  0x23   :  { %67 = dma.hbm_to_vmem [thread:$0]  %s3830_s4, 512, %s3341_s12, [#allocation9], %s3279_s21, %s3279_s21, %s3280_s22  }
  0x24   :  { %s3281_s14 = smov [#allocation2]   ;;  %s3282_s16 = smov [#allocation7]  }
  0x25   :  { %s23_s15 = sshll.u32 %s3281_s14, 4  ;;  %s49_s17 = sshll.u32 %s3282_s16, 4  ;;  %s24_s15 = int_to_ptr.vmem [resolvable:$true] %s23_s15  ;;  %s3378_s17 = int_to_ptr.vmem [resolvable:$true] %s49_s17 }
  0x26   :  { %s3181_s20 = scalar_lea.hbm %s3826_s0, 256 }
  0x27   :  { %p3182_p2 = scmp.ne.s32.totalorder %s3826_s0, %s3181_s20  ;;  %p3185_p3 = scmp.lt.u32.totalorder %s3181_s20, %s3826_s0 }
  0x29   :  { %p3187_p4 = pnand %p3185_p3, %p3182_p2 }
  0x2b   :  { %3190 = shalt.err (!%p3187_p4)
}
  0x2c   :  { %s3191_s4 = scalar_lea.vmem %s24_s15, 256  ;;  %p3196_p6 = scmp.lt.s32.totalorder %s24_s15, %s24_s15 }
  0x2d   :  { %p3192_p5 = scmp.ne.s32.totalorder %s24_s15, %s3191_s4  ;;  %p3197_p7 = scmp.lt.s32.totalorder %s3191_s4, %s3191_s4 }
  0x2f   :  { %p3198_p8 = por %p3197_p7, %p3196_p6 }
  0x31   :  { %p3199_p9 = pnand %p3198_p8, %p3192_p5 }
  0x33   :  { %3202 = shalt.err (!%p3199_p9)
}
  0x34   :  { %29 = dma.hbm_to_vmem [thread:$0]  %s3826_s0, 256, %s24_s15, [#allocation3], %s3279_s21, %s3279_s21, %s3280_s22  }
  0x35   :  { %s3203_s30 = scalar_lea.hbm %s3829_s3, 256 }
  0x36   :  { %p3204_p10 = scmp.ne.s32.totalorder %s3829_s3, %s3203_s30  ;;  %p3207_p11 = scmp.lt.u32.totalorder %s3203_s30, %s3829_s3 }
  0x38   :  { %p3209_p12 = pnand %p3207_p11, %p3204_p10 }
  0x3a   :  { %3212 = shalt.err (!%p3209_p12)
}
  0x3b   :  { %s3213_s14 = scalar_lea.vmem %s3378_s17, 256  ;;  %p3218_p0 = scmp.lt.s32.totalorder %s3378_s17, %s3378_s17 }
  0x3c   :  { %p3214_p13 = scmp.ne.s32.totalorder %s3378_s17, %s3213_s14  ;;  %p3219_p1 = scmp.lt.s32.totalorder %s3213_s14, %s3213_s14 }
  0x3e   :  { %p3220_p2 = por %p3219_p1, %p3218_p0 }
  0x40   :  { %p3221_p3 = pnand %p3220_p2, %p3214_p13 }
  0x42   :  { %3224 = shalt.err (!%p3221_p3)
}
  0x43   :  { %55 = dma.hbm_to_vmem [thread:$0]  %s3829_s3, 256, %s3378_s17, [#allocation6], %s3279_s21, %s3279_s21, %s3280_s22  }
  0x44   :  { %s3283_s16 = smov [#allocation10]   ;;  %s3225_s23 = scalar_lea.hbm %s3834_s8, 256 }
  0x45   :  { %s79_s18 = sshll.u32 %s3283_s16, 4  ;;  %p3226_p4 = scmp.ne.s32.totalorder %s3834_s8, %s3225_s23  ;;  %s80_s18 = int_to_ptr.vmem [resolvable:$true] %s79_s18 }
  0x46   :  { %p3229_p5 = scmp.lt.u32.totalorder %s3225_s23, %s3834_s8 }
  0x48   :  { %p3231_p6 = pnand %p3229_p5, %p3226_p4 }
  0x4a   :  { %3234 = shalt.err (!%p3231_p6)
}
  0x4b   :  { %s3235_s12 = scalar_lea.vmem %s80_s18, 256  ;;  %p3240_p8 = scmp.lt.s32.totalorder %s80_s18, %s80_s18 }
  0x4c   :  { %p3236_p7 = scmp.ne.s32.totalorder %s80_s18, %s3235_s12  ;;  %p3241_p9 = scmp.lt.s32.totalorder %s3235_s12, %s3235_s12 }
  0x4e   :  { %p3242_p10 = por %p3241_p9, %p3240_p8 }
  0x50   :  { %p3243_p11 = pnand %p3242_p10, %p3236_p7 }
  0x52   :  { %3246 = shalt.err (!%p3243_p11)
}
  0x53   :  { %85 = dma.hbm_to_vmem [thread:$0]  %s3834_s8, 256, %s80_s18, [#allocation9], %s3279_s21, %s3279_s21, %s3280_s22  }
  0x54   :  { %3269 = dma.done.wait [#allocation3], 256  }
  0x55   :  { %3270 = vsyncadd [#allocation3], 4294967040 }
  0x56   :  { %3271 = dma.done.wait [#allocation6], 512  }
  0x57   :  { %3272 = vsyncadd [#allocation6], 4294966784 }
  0x58   :  { %3273 = dma.done.wait [#allocation9], 768  }
  0x59   :  { %3274 = vsyncadd [#allocation9], 4294966528  ;;  %vm126_vm0 = vcmask 130048   ;;  %v122_v0 = vld [vmem:[#allocation5] sm:$0xff]  ;;  %v123_v1 = vld [vmem:[#allocation5 + $0x8] sm:$0xff]  ;;  %s3284_s8 = smov 64  }
  0x5a   :  { %v120_v2 = vld [vmem:[#allocation2] sm:$0xff]  ;;  %v2877_v3 = vpack.c.bf16 %v123_v1, %v122_v0  ;;  %v121_v4 = vld [vmem:[#allocation2 + $0x8] sm:$0xff]  ;;  %v103_v18 = vld [vmem:[%s3828_s2 + $0x10] sm:$0xff]  ;;  %v3285_v19 = vmov 0.0|0.0   ;;  %vm3286_vm1 = vmmov 0   ;;  %v3287_v22 = vmov 0.0  }
  0x5b   :  { %2610 = vmatprep.mubr.msk.f32.mxu0 %vm126_vm0, %v120_v2  ;;  %v124_v5 = vld [vmem:[#allocation7] sm:$0xff]  ;;  %v102_v17 = vld [vmem:[%s3828_s2 + $0x8] sm:$0xff]  ;;  %2881 = vmatprep.subr.bf16.mxu1 %v3285_v19  ;;  %v104_v21 = vld [vmem:[%s3828_s2 + $0x18] sm:$0xff]  ;;  %s3289_s20 = smov 32   ;;  %vm227_vm2 = vcmask 261120   ;;  %vm2318_vm3 = vcmask 1041408  }
  0x5c   :  { %2878 = vmatprep.subr.bf16.mxu0 %v2877_v3  ;;  %v101_v16 = vld [vmem:[%s3828_s2] sm:$0xff]  ;;  %2621 = vmatprep.mubr.msk.f32.mxu1 %vm3286_vm1, %v3287_v22  ;;  %v3461_v23 = vpack.c.bf16 %v104_v21, %v103_v18  ;;  %s3288_s2 = smov 96   ;;  %v110_v26 = vld [vmem:[%s3831_s5 + $0x8] sm:$0xff]  ;;  %v111_v28 = vld [vmem:[%s3831_s5 + $0x10] sm:$0xff]  ;;  %vm2320_vm4 = vcmask 1043456   ;;  %vm2322_vm5 = vcmask 1045504  }
  0x5d   :  { %2880 = vmatpush3.bf16.msra.mxu0 %v2877_v3  ;;  %v3450_v20 = vpack.c.bf16 %v102_v17, %v101_v16  ;;  %v109_v25 = vld [vmem:[%s3831_s5] sm:$0xff]  ;;  %v112_v29 = vld [vmem:[%s3831_s5 + $0x18] sm:$0xff]  ;;  %v105_v33 = vld [vmem:[#allocation8] sm:$0xff]  ;;  %vm2436_vm6 = vcmask 123904  }
  0x5e   :  { %2887 = vmatprep.subr.bf16.mxu0 %v3285_v19  ;;  %v3472_v27 = vpack.c.bf16 %v110_v26, %v109_v25  ;;  %v3482_v30 = vpack.c.bf16 %v112_v29, %v111_v28  ;;  %v106_v34 = vld [vmem:[#allocation8 + $0x8] sm:$0xff]  ;;  %v107_v36 = vld [vmem:[#allocation8 + $0x10] sm:$0xff]  ;;  %v108_v37 = vld [vmem:[#allocation8 + $0x18] sm:$0xff] }
  0x5f   :  { %2883 = vmatpush3.bf16.msra.mxu1 %v3450_v20  ;;  %v3494_v35 = vpack.c.bf16 %v106_v34, %v105_v33  ;;  %v3498_v39 = vpack.c.bf16 %v108_v37, %v107_v36  ;;  %v3516_v46 = vld [vmem:[%s3832_s6] sm:$0x3] }
  0x60   :  { %2611 = vmatmul.mubr.msk.f32.vlgmr.msra.gmra.mrb[0].mxu0 %vm126_vm0, %v121_v4  ;;  %2884 = vmatprep.subr.bf16.mxu1 %v3285_v19 }
  0x61   :  { %2632 = vmatprep.mubr.msk.f32.mxu0 %vm3286_vm1, %v3287_v22  ;;  %2889 = vmatpush3.bf16.msra.mxu0 %v3472_v27 }
  0x62   :  { %2890 = vmatprep.subr.bf16.mxu0 %v3285_v19 }
  0x63   :  { %2886 = vmatpush3.bf16.msra.mxu1 %v3461_v23 }
  0x64   :  { %2893 = vmatprep.subr.bf16.mxu1 %v3285_v19 }
  0x65   :  { %2892 = vmatpush3.bf16.msra.mxu0 %v3482_v30 }
  0x66   :  { %2899 = vmatprep.subr.bf16.mxu0 %v3285_v19 }
  0x68   :  { %2633 = vmatmul.mubr.f32.vlgmr.msra.gmra.mrb[2].mxu0 %v3287_v22 }
  0x69   :  { %2901 = vmatpush3.bf16.msra.mxu0 %v3450_v20  ;;  %2654 = vmatprep.mubr.msk.f32.mxu0 %vm3286_vm1, %v3287_v22 }
  0x6a   :  { %2902 = vmatprep.subr.bf16.mxu0 %v3285_v19 }
  0x6d   :  { %2904 = vmatpush3.bf16.msra.mxu0 %v3461_v23 }
  0x6e   :  { %2911 = vmatprep.subr.bf16.mxu0 %v3285_v19 }
 0x133   :  { %v3430_v6 = vpop.f32.mrb[0].mxu0 }
 0x134   :  { %v199_v7 = vpop.f32.mrb[1].mxu0 }
 0x135   :  { %v3432_v8 = vadd.f32 %v199_v7, %v124_v5 }
 0x137   :  { %3041 = vtanh.f32 %v3432_v8  ;;  %v208_v10 = vmul.f32 0.5, %v3432_v8 }
 0x139   :  { %3043 = vtanh.f32 %v208_v10 }
 0x13b   :  { %v373_v40 = vpop.f32.mrb[2].mxu0 }
 0x13c   :  { %v2634_v41 = vpop.f32.mrb[3].mxu0 }
 0x141   :  { %v3042_v9 = vpop.eup %3041 }
 0x142   :  { %214 = vrot.lane.b32.xlu0 %v3042_v9, %s3284_s8 }
 0x143   :  { %v3044_v11 = vpop.eup %3043 }
 0x144   :  { %v210_v12 = vmul.f32 0.5, %v3044_v11 }
 0x146   :  { %v211_v13 = vadd.f32 0.5, %v210_v12 }
 0x1b4   :  { %v215_v14 = vpop.permute.xlu0 %214 }
 0x1b5   :  { %v3437_v15 = vmul.f32 %v215_v14, %v211_v13 }
 0x1b7   :  { %3045 = vtanh.f32 %v3437_v15  ;;  %v454_v52 = vrot.slane %v3437_v15, 6 }
 0x1c1   :  { %v3046_v24 = vpop.eup %3045 }
 0x1c2   :  { %220 = vrot.lane.b32.xlu0 %v3046_v24, %s3288_s2 }
 0x234   :  { %v221_v31 = vpop.permute.xlu0 %220 }
 0x235   :  { %v223_v32 = vmul.f32 %v221_v31, %v211_v13 }
 0x237   :  { %225 = vrot.lane.b32.xlu1 %v223_v32, %s3289_s20 }
 0x2a9   :  { %v226_v38 = vpop.permute.xlu1 %225 }
 0x2aa   :  { %2622 = vmatmul.mubr.msk.f32.vlgmr.msra.gmra.mrb[0].mxu1 %vm227_vm2, %v226_v38 }
 0x2ab   :  { %2895 = vmatpush3.bf16.msra.mxu1 %v3494_v35  ;;  %2643 = vmatprep.mubr.msk.f32.mxu1 %vm3286_vm1, %v3287_v22 }
 0x2ac   :  { %2896 = vmatprep.subr.bf16.mxu1 %v3285_v19 }
 0x2af   :  { %2898 = vmatpush3.bf16.msra.mxu1 %v3498_v39 }
 0x2b0   :  { %2905 = vmatprep.subr.bf16.mxu1 %v3285_v19 }
 0x2b2   :  { %2644 = vmatmul.mubr.msk.f32.vlgmr.msra.gmra.mrb[2].mxu1 %vm227_vm2, %v226_v38 }
 0x2b3   :  { %2907 = vmatpush3.bf16.msra.mxu1 %v3472_v27  ;;  %2665 = vmatprep.mubr.msk.f32.mxu1 %vm3286_vm1, %v3287_v22 }
 0x2b4   :  { %2908 = vmatprep.subr.bf16.mxu1 %v3285_v19 }
 0x2b7   :  { %2910 = vmatpush3.bf16.msra.mxu1 %v3482_v30 }
 0x2b8   :  { %2917 = vmatprep.subr.bf16.mxu1 %v3285_v19 }
 0x37d   :  { %v296_v42 = vpop.f32.mrb[0].mxu1 }
 0x37e   :  { %v301_v43 = vrot.slane %v296_v42, 6  ;;  %v2623_v44 = vpop.f32.mrb[1].mxu1 }
 0x380   :  { %v303_v45 = vadd.f32 %v301_v43, %v3432_v8 }
 0x382   :  { %3047 = vtanh.f32 %v303_v45  ;;  %v448_v54 = vmul.f32 0.5, %v303_v45 }
 0x385   :  { %v443_v47 = vpop.f32.mrb[2].mxu1 }
 0x386   :  { %v444_v48 = vadd.f32 %v443_v47, %v373_v40  ;;  %v2645_v49 = vpop.f32.mrb[3].mxu1 }
 0x388   :  { %v447_v50 = vadd.f32 %v444_v48, %v3516_v46 }
 0x38a   :  { %3049 = vtanh.f32 %v447_v50  ;;  %v475_v55 = vmul.f32 0.5, %v447_v50 }
 0x38b   :  { %3051 = vtanh.f32 %v448_v54 }
 0x38c   :  { %v3048_v51 = vpop.eup %3047  ;;  %3053 = vtanh.f32 %v475_v55 }
 0x38d   :  { %460 = vrot.lane.b32.xlu1 %v3048_v51, %s3284_s8 }
 0x391   :  { %455 = vrot.lane.b32.xlu1 %v454_v52, %s3289_s20 }
 0x394   :  { %v3050_v53 = vpop.eup %3049 }
 0x395   :  { %482 = vrot.lane.b32.xlu0 %v3050_v53, %s3284_s8  ;;  %v3052_v56 = vpop.eup %3051 }
 0x396   :  { %v450_v57 = vmul.f32 0.5, %v3052_v56  ;;  %v3054_v59 = vpop.eup %3053 }
 0x397   :  { %v477_v62 = vmul.f32 0.5, %v3054_v59 }
 0x398   :  { %v451_v58 = vadd.f32 0.5, %v450_v57 }
 0x399   :  { %v478_v63 = vadd.f32 0.5, %v477_v62 }
 0x39b   :  { %v480_v7 = vmul.f32 0.0, %v478_v63 }
 0x3ff   :  { %v461_v60 = vpop.permute.xlu1 %460 }
 0x400   :  { %v463_v61 = vmul.f32 %v461_v60, %v451_v58 }
 0x402   :  { %465 = vrot.lane.b32.xlu0 %v463_v61, %s3289_s20 }
 0x403   :  { %v456_v2 = vpop.permute.xlu1 %455 }
 0x404   :  { %v458_v3 = vmul.f32 %v456_v2, %v451_v58 }
 0x407   :  { %v483_v0 = vpop.permute.xlu0 %482 }
 0x408   :  { %v485_v1 = vmul.f32 %v483_v0, %v478_v63 }
 0x40a   :  { %487 = vrot.lane.b32.xlu1 %v485_v1, %s3289_s20 }
 0x474   :  { %v466_v4 = vpop.permute.xlu0 %465 }
 0x475   :  { %v3525_v5 = vadd.f32 %v466_v4, %v458_v3 }
 0x477   :  { %3055 = vtanh.f32 %v3525_v5  ;;  %v729_v53 = vrot.slane %v3525_v5, 6 }
 0x47c   :  { %v488_v9 = vpop.permute.xlu1 %487 }
 0x47d   :  { %v3528_v10 = vadd.f32 %v488_v9, %v480_v7 }
 0x47f   :  { %3057 = vtanh.f32 %v3528_v10 }
 0x481   :  { %v3056_v11 = vpop.eup %3055 }
 0x482   :  { %471 = vrot.lane.b32.xlu0 %v3056_v11, %s3284_s8 }
 0x489   :  { %v3058_v12 = vpop.eup %3057 }
 0x48a   :  { %493 = vrot.lane.b32.xlu1 %v3058_v12, %s3284_s8 }
 0x4f4   :  { %v472_v13 = vpop.permute.xlu0 %471 }
 0x4f5   :  { %v474_v14 = vmul.f32 %v472_v13, %v451_v58 }
 0x4f7   :  { %v498_v15 = vrot.slane %v474_v14, 2 }
 0x4f9   :  { %499 = vrot.lane.b32.xlu0 %v498_v15, %s3289_s20 }
 0x4fc   :  { %v494_v16 = vpop.permute.xlu1 %493 }
 0x4fd   :  { %v3534_v17 = vmul.f32 %v494_v16, %v478_v63 }
 0x4ff   :  { %578 = vrot.lane.b32.xlu1 %v3534_v17, %s3289_s20 }
 0x56b   :  { %v500_v18 = vpop.permute.xlu0 %499 }
 0x56c   :  { %2655 = vmatmul.mubr.msk.f32.vlgmr.msra.gmra.mrb[4].mxu0 %vm227_vm2, %v500_v18 }
 0x56d   :  { %2913 = vmatpush3.bf16.msra.mxu0 %v3494_v35  ;;  %2676 = vmatprep.mubr.msk.f32.mxu0 %vm3286_vm1, %v3287_v22 }
 0x56e   :  { %2914 = vmatprep.subr.bf16.mxu0 %v3285_v19 }
 0x571   :  { %2916 = vmatpush3.bf16.msra.mxu0 %v3498_v39  ;;  %v579_v21 = vpop.permute.xlu1 %578 }
 0x572   :  { %2666 = vmatmul.mubr.msk.f32.vlgmr.msra.gmra.mrb[4].mxu1 %vm227_vm2, %v579_v21  ;;  %2923 = vmatprep.subr.bf16.mxu0 %v3285_v19 }
 0x573   :  { %2919 = vmatpush3.bf16.msra.mxu1 %v3450_v20  ;;  %2687 = vmatprep.mubr.msk.f32.mxu1 %vm3286_vm1, %v3287_v22 }
 0x574   :  { %2677 = vmatmul.mubr.msk.f32.vlgmr.msra.gmra.mrb[6].mxu0 %vm227_vm2, %v500_v18  ;;  %2920 = vmatprep.subr.bf16.mxu1 %v3285_v19 }
 0x575   :  { %2925 = vmatpush3.bf16.msra.mxu0 %v3472_v27  ;;  %2698 = vmatprep.mubr.msk.f32.mxu0 %vm3286_vm1, %v3287_v22 }
 0x576   :  { %2926 = vmatprep.subr.bf16.mxu0 %v3285_v19 }
 0x577   :  { %2922 = vmatpush3.bf16.msra.mxu1 %v3461_v23 }
 0x578   :  { %2929 = vmatprep.subr.bf16.mxu1 %v3285_v19 }
 0x579   :  { %2928 = vmatpush3.bf16.msra.mxu0 %v3482_v30 }
 0x57a   :  { %2935 = vmatprep.subr.bf16.mxu0 %v3285_v19 }
 0x63f   :  { %v569_v24 = vpop.f32.mrb[4].mxu0 }
 0x640   :  { %v574_v25 = vrot.slane %v569_v24, 4  ;;  %v2656_v26 = vpop.f32.mrb[5].mxu0 }
 0x642   :  { %v576_v28 = vadd.f32 %v574_v25, %v3432_v8 }
 0x644   :  { %3059 = vtanh.f32 %v576_v28  ;;  %v723_v40 = vmul.f32 0.5, %v576_v28 }
 0x645   :  { %v648_v29 = vpop.f32.mrb[4].mxu1 }
 0x646   :  { %v2667_v31 = vpop.f32.mrb[5].mxu1 }
 0x647   :  { %v718_v32 = vpop.f32.mrb[6].mxu0 }
 0x648   :  { %v719_v33 = vadd.f32 %v718_v32, %v648_v29  ;;  %v2678_v34 = vpop.f32.mrb[7].mxu0 }
 0x64a   :  { %v722_v36 = vadd.f32 %v719_v33, %v3516_v46 }
 0x64c   :  { %3061 = vtanh.f32 %v722_v36  ;;  %v748_v41 = vmul.f32 0.5, %v722_v36 }
 0x64d   :  { %3063 = vtanh.f32 %v723_v40 }
 0x64e   :  { %v3060_v37 = vpop.eup %3059  ;;  %3065 = vtanh.f32 %v748_v41 }
 0x64f   :  { %733 = vrot.lane.b32.xlu0 %v3060_v37, %s3284_s8 }
 0x656   :  { %v3062_v38 = vpop.eup %3061 }
 0x657   :  { %755 = vrot.lane.b32.xlu1 %v3062_v38, %s3284_s8  ;;  %v3064_v42 = vpop.eup %3063 }
 0x658   :  { %v725_v43 = vmul.f32 0.5, %v3064_v42  ;;  %v3066_v45 = vpop.eup %3065 }
 0x659   :  { %v750_v49 = vmul.f32 0.5, %v3066_v45 }
 0x65a   :  { %v726_v44 = vadd.f32 0.5, %v725_v43 }
 0x65b   :  { %v751_v50 = vadd.f32 0.5, %v750_v49 }
 0x65c   :  { %v731_v54 = vmul.f32 %v729_v53, %v726_v44 }
 0x65d   :  { %v753_v57 = vmul.f32 %v751_v50, %v3528_v10 }
 0x6c1   :  { %v734_v47 = vpop.permute.xlu0 %733 }
 0x6c2   :  { %v736_v48 = vmul.f32 %v734_v47, %v726_v44 }
 0x6c4   :  { %738 = vrot.lane.b32.xlu0 %v736_v48, %s3289_s20 }
 0x6c9   :  { %v756_v51 = vpop.permute.xlu1 %755 }
 0x6ca   :  { %v758_v52 = vmul.f32 %v756_v51, %v751_v50 }
 0x6cc   :  { %760 = vrot.lane.b32.xlu1 %v758_v52, %s3289_s20 }
 0x736   :  { %v739_v55 = vpop.permute.xlu0 %738 }
 0x737   :  { %v3566_v56 = vadd.f32 %v739_v55, %v731_v54 }
 0x739   :  { %3067 = vtanh.f32 %v3566_v56  ;;  %v1002_v38 = vrot.slane %v3566_v56, 6 }
 0x73e   :  { %v761_v58 = vpop.permute.xlu1 %760 }
 0x73f   :  { %v3570_v59 = vadd.f32 %v761_v58, %v753_v57 }
 0x741   :  { %3069 = vtanh.f32 %v3570_v59 }
 0x743   :  { %v3068_v60 = vpop.eup %3067 }
 0x744   :  { %744 = vrot.lane.b32.xlu0 %v3068_v60, %s3284_s8 }
 0x74b   :  { %v3070_v61 = vpop.eup %3069 }
 0x74c   :  { %766 = vrot.lane.b32.xlu1 %v3070_v61, %s3284_s8 }
 0x7b6   :  { %v745_v62 = vpop.permute.xlu0 %744 }
 0x7b7   :  { %v747_v63 = vmul.f32 %v745_v62, %v726_v44 }
 0x7b9   :  { %v771_v0 = vrot.slane %v747_v63, 4 }
 0x7bb   :  { %772 = vrot.lane.b32.xlu0 %v771_v0, %s3289_s20 }
 0x7be   :  { %v767_v1 = vpop.permute.xlu1 %766 }
 0x7bf   :  { %v3576_v2 = vmul.f32 %v767_v1, %v751_v50 }
 0x7c1   :  { %851 = vrot.lane.b32.xlu1 %v3576_v2, %s3289_s20  ;;  %v2305_v52 = vrot.slane %v3576_v2, 6 }
 0x7c3   :  { %v2319_v56 = vsel %vm2318_vm3, %v3534_v17, %v2305_v52  ;;  %v125_v17 = vld [vmem:[#allocation7 + $0x8] sm:$0xff] }
 0x7c4   :  { %v3647_v60 = vadd.f32 %v3430_v6, %v125_v17 }
 0x82d   :  { %v773_v3 = vpop.permute.xlu0 %772 }
 0x82e   :  { %2688 = vmatmul.mubr.msk.f32.vlgmr.msra.gmra.mrb[6].mxu1 %vm227_vm2, %v773_v3 }
 0x82f   :  { %2931 = vmatpush3.bf16.msra.mxu1 %v3494_v35  ;;  %2709 = vmatprep.mubr.msk.f32.mxu1 %vm3286_vm1, %v3287_v22 }
 0x830   :  { %2932 = vmatprep.subr.bf16.mxu1 %v3285_v19 }
 0x833   :  { %2934 = vmatpush3.bf16.msra.mxu1 %v3498_v39  ;;  %v852_v4 = vpop.permute.xlu1 %851 }
 0x834   :  { %2699 = vmatmul.mubr.msk.f32.vlgmr.msra.gmra.mrb[8].mxu0 %vm227_vm2, %v852_v4  ;;  %2941 = vmatprep.subr.bf16.mxu1 %v3285_v19 }
 0x835   :  { %2937 = vmatpush3.bf16.msra.mxu0 %v3450_v20  ;;  %2720 = vmatprep.mubr.msk.f32.mxu0 %vm3286_vm1, %v3287_v22 }
 0x836   :  { %2710 = vmatmul.mubr.msk.f32.vlgmr.msra.gmra.mrb[8].mxu1 %vm227_vm2, %v773_v3  ;;  %2938 = vmatprep.subr.bf16.mxu0 %v3285_v19 }
 0x837   :  { %2943 = vmatpush3.bf16.msra.mxu1 %v3472_v27  ;;  %2731 = vmatprep.mubr.msk.f32.mxu1 %vm3286_vm1, %v3287_v22 }
 0x838   :  { %2944 = vmatprep.subr.bf16.mxu1 %v3285_v19 }
 0x839   :  { %2940 = vmatpush3.bf16.msra.mxu0 %v3461_v23 }
 0x83a   :  { %2947 = vmatprep.subr.bf16.mxu0 %v3285_v19 }
 0x83b   :  { %2946 = vmatpush3.bf16.msra.mxu1 %v3482_v30 }
 0x83c   :  { %2953 = vmatprep.subr.bf16.mxu1 %v3285_v19 }
 0x901   :  { %v842_v5 = vpop.f32.mrb[6].mxu1 }
 0x902   :  { %v847_v7 = vrot.slane %v842_v5, 2  ;;  %v2689_v9 = vpop.f32.mrb[7].mxu1 }
 0x904   :  { %v849_v10 = vadd.f32 %v847_v7, %v3432_v8 }
 0x906   :  { %3071 = vtanh.f32 %v849_v10  ;;  %v996_v24 = vmul.f32 0.5, %v849_v10 }
 0x907   :  { %v921_v11 = vpop.f32.mrb[8].mxu0 }
 0x908   :  { %v2700_v12 = vpop.f32.mrb[9].mxu0 }
 0x909   :  { %v991_v13 = vpop.f32.mrb[8].mxu1 }
 0x90a   :  { %v992_v14 = vadd.f32 %v991_v13, %v921_v11  ;;  %v2711_v15 = vpop.f32.mrb[9].mxu1 }
 0x90c   :  { %v995_v16 = vadd.f32 %v992_v14, %v3516_v46 }
 0x90e   :  { %3073 = vtanh.f32 %v995_v16  ;;  %v1021_v25 = vmul.f32 0.5, %v995_v16 }
 0x90f   :  { %3075 = vtanh.f32 %v996_v24 }
 0x910   :  { %v3072_v18 = vpop.eup %3071  ;;  %3077 = vtanh.f32 %v1021_v25 }
 0x911   :  { %1006 = vrot.lane.b32.xlu0 %v3072_v18, %s3284_s8 }
 0x918   :  { %v3074_v21 = vpop.eup %3073 }
 0x919   :  { %1028 = vrot.lane.b32.xlu1 %v3074_v21, %s3284_s8  ;;  %v3076_v8 = vpop.eup %3075 }
 0x91a   :  { %v998_v26 = vmul.f32 0.5, %v3076_v8  ;;  %v3078_v29 = vpop.eup %3077 }
 0x91b   :  { %v1023_v33 = vmul.f32 0.5, %v3078_v29 }
 0x91c   :  { %v999_v28 = vadd.f32 0.5, %v998_v26 }
 0x91d   :  { %v1024_v34 = vadd.f32 0.5, %v1023_v33 }
 0x91e   :  { %v1004_v40 = vmul.f32 %v1002_v38, %v999_v28 }
 0x91f   :  { %v1026_v43 = vmul.f32 %v1024_v34, %v3570_v59 }
 0x983   :  { %v1007_v31 = vpop.permute.xlu0 %1006 }
 0x984   :  { %v1009_v32 = vmul.f32 %v1007_v31, %v999_v28 }
 0x986   :  { %1011 = vrot.lane.b32.xlu0 %v1009_v32, %s3289_s20 }
 0x98b   :  { %v1029_v36 = vpop.permute.xlu1 %1028 }
 0x98c   :  { %v1031_v37 = vmul.f32 %v1029_v36, %v1024_v34 }
 0x98e   :  { %1033 = vrot.lane.b32.xlu1 %v1031_v37, %s3289_s20 }
 0x9f8   :  { %v1012_v41 = vpop.permute.xlu0 %1011 }
 0x9f9   :  { %v3608_v42 = vadd.f32 %v1012_v41, %v1004_v40 }
 0x9fb   :  { %3079 = vtanh.f32 %v3608_v42  ;;  %v1272_v8 = vrot.slane %v3608_v42, 6 }
 0xa00   :  { %v1034_v44 = vpop.permute.xlu1 %1033 }
 0xa01   :  { %v3612_v45 = vadd.f32 %v1034_v44, %v1026_v43 }
 0xa03   :  { %3081 = vtanh.f32 %v3612_v45 }
 0xa05   :  { %v3080_v47 = vpop.eup %3079 }
 0xa06   :  { %1017 = vrot.lane.b32.xlu0 %v3080_v47, %s3284_s8 }
 0xa0d   :  { %v3082_v48 = vpop.eup %3081 }
 0xa0e   :  { %1039 = vrot.lane.b32.xlu1 %v3082_v48, %s3284_s8 }
 0xa78   :  { %v1018_v49 = vpop.permute.xlu0 %1017 }
 0xa79   :  { %v1020_v50 = vmul.f32 %v1018_v49, %v999_v28 }
 0xa7b   :  { %v1044_v51 = vrot.slane %v1020_v50, 6 }
 0xa7d   :  { %1045 = vrot.lane.b32.xlu0 %v1044_v51, %s3289_s20 }
 0xa80   :  { %v1040_v53 = vpop.permute.xlu1 %1039 }
 0xa81   :  { %v1042_v54 = vmul.f32 %v1040_v53, %v1024_v34 }
 0xa83   :  { %v2307_v55 = vrot.slane %v1042_v54, 4  ;;  %1121 = vrot.lane.b32.xlu1 %v1042_v54, %s3289_s20 }
 0xa85   :  { %v3623_v57 = vsel %vm2320_vm4, %v2319_v56, %v2307_v55 }
 0xaef   :  { %v1046_v58 = vpop.permute.xlu0 %1045 }
 0xaf0   :  { %2721 = vmatmul.mubr.msk.f32.vlgmr.msra.gmra.mrb[10].mxu0 %vm227_vm2, %v1046_v58 }
 0xaf1   :  { %2949 = vmatpush3.bf16.msra.mxu0 %v3494_v35  ;;  %2742 = vmatprep.mubr.msk.f32.mxu0 %vm3286_vm1, %v3287_v22 }
 0xaf2   :  { %2950 = vmatprep.subr.bf16.mxu0 %v3285_v19 }
 0xaf5   :  { %2952 = vmatpush3.bf16.msra.mxu0 %v3498_v39  ;;  %v1122_v59 = vpop.permute.xlu1 %1121 }
 0xaf6   :  { %2732 = vmatmul.mubr.msk.f32.vlgmr.msra.gmra.mrb[10].mxu1 %vm227_vm2, %v1122_v59  ;;  %2959 = vmatprep.subr.bf16.mxu0 %v3285_v19 }
 0xaf7   :  { %2955 = vmatpush3.bf16.msra.mxu1 %v3450_v20  ;;  %2753 = vmatprep.mubr.msk.f32.mxu1 %vm3286_vm1, %v3287_v22 }
 0xaf8   :  { %2743 = vmatmul.mubr.msk.f32.vlgmr.msra.gmra.mrb[12].mxu0 %vm227_vm2, %v1046_v58  ;;  %2956 = vmatprep.subr.bf16.mxu1 %v3285_v19 }
 0xaf9   :  { %2961 = vmatpush3.bf16.msra.mxu0 %v3472_v27  ;;  %2764 = vmatprep.mubr.msk.f32.mxu0 %vm3286_vm1, %v3287_v22 }
 0xafa   :  { %2962 = vmatprep.subr.bf16.mxu0 %v3285_v19 }
 0xafb   :  { %2958 = vmatpush3.bf16.msra.mxu1 %v3461_v23 }
 0xafc   :  { %2965 = vmatprep.subr.bf16.mxu1 %v3285_v19 }
 0xafd   :  { %2964 = vmatpush3.bf16.msra.mxu0 %v3482_v30 }
 0xafe   :  { %2971 = vmatprep.subr.bf16.mxu0 %v3285_v19 }
 0xbc3   :  { %v1115_v61 = vpop.f32.mrb[10].mxu0 }
 0xbc4   :  { %v1119_v62 = vadd.f32 %v1115_v61, %v3647_v60  ;;  %v2722_v63 = vpop.f32.mrb[11].mxu0 }
 0xbc6   :  { %3083 = vtanh.f32 %v1119_v62  ;;  %v1266_v6 = vmul.f32 0.5, %v1119_v62 }
 0xbc9   :  { %v1191_v0 = vpop.f32.mrb[10].mxu1 }
 0xbca   :  { %v2733_v1 = vpop.f32.mrb[11].mxu1 }
 0xbcb   :  { %v1261_v2 = vpop.f32.mrb[12].mxu0 }
 0xbcc   :  { %v1262_v3 = vadd.f32 %v1261_v2, %v1191_v0  ;;  %v2744_v4 = vpop.f32.mrb[13].mxu0 }
 0xbce   :  { %v1265_v5 = vadd.f32 %v1262_v3, %v3516_v46 }
 0xbd0   :  { %v3084_v7 = vpop.eup %3083  ;;  %3085 = vtanh.f32 %v1265_v5  ;;  %v1291_v10 = vmul.f32 0.5, %v1265_v5 }
 0xbd1   :  { %1276 = vrot.lane.b32.xlu0 %v3084_v7, %s3284_s8  ;;  %3087 = vtanh.f32 %v1266_v6 }
 0xbd2   :  { %3089 = vtanh.f32 %v1291_v10 }
 0xbda   :  { %v3086_v9 = vpop.eup %3085 }
 0xbdb   :  { %1298 = vrot.lane.b32.xlu1 %v3086_v9, %s3284_s8  ;;  %v3088_v11 = vpop.eup %3087 }
 0xbdc   :  { %v1268_v12 = vmul.f32 0.5, %v3088_v11  ;;  %v3090_v16 = vpop.eup %3089 }
 0xbdd   :  { %v1293_v18 = vmul.f32 0.5, %v3090_v16 }
 0xbde   :  { %v1269_v13 = vadd.f32 0.5, %v1268_v12 }
 0xbdf   :  { %v1294_v21 = vadd.f32 0.5, %v1293_v18 }
 0xbe0   :  { %v1274_v26 = vmul.f32 %v1272_v8, %v1269_v13 }
 0xbe1   :  { %v1296_v31 = vmul.f32 %v1294_v21, %v3612_v45 }
 0xc43   :  { %v1277_v14 = vpop.permute.xlu0 %1276 }
 0xc44   :  { %v1279_v15 = vmul.f32 %v1277_v14, %v1269_v13 }
 0xc46   :  { %1281 = vrot.lane.b32.xlu0 %v1279_v15, %s3289_s20 }
 0xc4d   :  { %v1299_v24 = vpop.permute.xlu1 %1298 }
 0xc4e   :  { %v1301_v25 = vmul.f32 %v1299_v24, %v1294_v21 }
 0xc50   :  { %1303 = vrot.lane.b32.xlu1 %v1301_v25, %s3289_s20 }
 0xcb8   :  { %v1282_v28 = vpop.permute.xlu0 %1281 }
 0xcb9   :  { %v3656_v29 = vadd.f32 %v1282_v28, %v1274_v26 }
 0xcbb   :  { %3091 = vtanh.f32 %v3656_v29  ;;  %v1544_v9 = vrot.slane %v3656_v29, 6 }
 0xcc2   :  { %v1304_v32 = vpop.permute.xlu1 %1303 }
 0xcc3   :  { %v3660_v33 = vadd.f32 %v1304_v32, %v1296_v31 }
 0xcc5   :  { %v3092_v34 = vpop.eup %3091  ;;  %3093 = vtanh.f32 %v3660_v33 }
 0xcc6   :  { %1287 = vrot.lane.b32.xlu0 %v3092_v34, %s3284_s8 }
 0xccf   :  { %v3094_v36 = vpop.eup %3093 }
 0xcd0   :  { %1309 = vrot.lane.b32.xlu1 %v3094_v36, %s3284_s8 }
 0xd38   :  { %v1288_v37 = vpop.permute.xlu0 %1287 }
 0xd39   :  { %v1290_v38 = vmul.f32 %v1288_v37, %v1269_v13 }
 0xd3b   :  { %1314 = vrot.lane.b32.xlu0 %v1290_v38, %s3289_s20 }
 0xd42   :  { %v1310_v40 = vpop.permute.xlu1 %1309 }
 0xd43   :  { %v1312_v41 = vmul.f32 %v1310_v40, %v1294_v21 }
 0xd45   :  { %v2309_v42 = vrot.slane %v1312_v41, 2  ;;  %1393 = vrot.lane.b32.xlu1 %v1312_v41, %s3289_s20 }
 0xd47   :  { %v3669_v43 = vsel %vm2322_vm5, %v3623_v57, %v2309_v42 }
 0xdad   :  { %v1315_v44 = vpop.permute.xlu0 %1314 }
 0xdae   :  { %2754 = vmatmul.mubr.msk.f32.vlgmr.msra.gmra.mrb[12].mxu1 %vm227_vm2, %v1315_v44 }
 0xdaf   :  { %2967 = vmatpush3.bf16.msra.mxu1 %v3494_v35  ;;  %2775 = vmatprep.mubr.msk.f32.mxu1 %vm3286_vm1, %v3287_v22 }
 0xdb0   :  { %2968 = vmatprep.subr.bf16.mxu1 %v3285_v19 }
 0xdb3   :  { %2970 = vmatpush3.bf16.msra.mxu1 %v3498_v39 }
 0xdb4   :  { %2977 = vmatprep.subr.bf16.mxu1 %v3285_v19 }
 0xdb6   :  { %2776 = vmatmul.mubr.msk.f32.vlgmr.msra.gmra.mrb[14].mxu1 %vm227_vm2, %v1315_v44 }
 0xdb7   :  { %v1394_v45 = vpop.permute.xlu1 %1393  ;;  %2979 = vmatpush3.bf16.msra.mxu1 %v3472_v27  ;;  %2797 = vmatprep.mubr.msk.f32.mxu1 %vm3286_vm1, %v3287_v22 }
 0xdb8   :  { %2765 = vmatmul.mubr.msk.f32.vlgmr.msra.gmra.mrb[14].mxu0 %vm227_vm2, %v1394_v45  ;;  %2980 = vmatprep.subr.bf16.mxu1 %v3285_v19 }
 0xdb9   :  { %2973 = vmatpush3.bf16.msra.mxu0 %v3450_v20  ;;  %2786 = vmatprep.mubr.msk.f32.mxu0 %vm3286_vm1, %v3287_v22 }
 0xdba   :  { %2974 = vmatprep.subr.bf16.mxu0 %v3285_v19 }
 0xdbb   :  { %2982 = vmatpush3.bf16.msra.mxu1 %v3482_v30 }
 0xdbc   :  { %2989 = vmatprep.subr.bf16.mxu1 %v3285_v19 }
 0xdbd   :  { %2976 = vmatpush3.bf16.msra.mxu0 %v3461_v23 }
 0xdbe   :  { %2983 = vmatprep.subr.bf16.mxu0 %v3285_v19 }
 0xe81   :  { %v1384_v47 = vpop.f32.mrb[12].mxu1 }
 0xe82   :  { %v1389_v48 = vrot.slane %v1384_v47, 6  ;;  %v2755_v49 = vpop.f32.mrb[13].mxu1 }
 0xe84   :  { %v1391_v50 = vadd.f32 %v1389_v48, %v3647_v60 }
 0xe86   :  { %3095 = vtanh.f32 %v1391_v50  ;;  %v1538_v59 = vmul.f32 0.5, %v1391_v50 }
 0xe89   :  { %v1533_v51 = vpop.f32.mrb[14].mxu1 }
 0xe8a   :  { %v2777_v52 = vpop.f32.mrb[15].mxu1 }
 0xe8b   :  { %v1463_v53 = vpop.f32.mrb[14].mxu0 }
 0xe8c   :  { %v1534_v54 = vadd.f32 %v1533_v51, %v1463_v53  ;;  %v2766_v55 = vpop.f32.mrb[15].mxu0 }
 0xe8e   :  { %v1537_v56 = vadd.f32 %v1534_v54, %v3516_v46 }
 0xe90   :  { %v3096_v57 = vpop.eup %3095  ;;  %3097 = vtanh.f32 %v1537_v56  ;;  %v1563_v17 = vmul.f32 0.5, %v1537_v56 }
 0xe91   :  { %1548 = vrot.lane.b32.xlu0 %v3096_v57, %s3284_s8  ;;  %3099 = vtanh.f32 %v1538_v59 }
 0xe92   :  { %3101 = vtanh.f32 %v1563_v17 }
 0xe9a   :  { %v3098_v58 = vpop.eup %3097 }
 0xe9b   :  { %1570 = vrot.lane.b32.xlu1 %v3098_v58, %s3284_s8  ;;  %v3100_v61 = vpop.eup %3099 }
 0xe9c   :  { %v1540_v62 = vmul.f32 0.5, %v3100_v61  ;;  %v3102_v2 = vpop.eup %3101 }
 0xe9d   :  { %v1565_v3 = vmul.f32 0.5, %v3102_v2 }
 0xe9e   :  { %v1541_v63 = vadd.f32 0.5, %v1540_v62 }
 0xe9f   :  { %v1566_v4 = vadd.f32 0.5, %v1565_v3 }
 0xea0   :  { %v1546_v6 = vmul.f32 %v1544_v9, %v1541_v63 }
 0xea1   :  { %v1568_v12 = vmul.f32 %v1566_v4, %v3660_v33 }
 0xf03   :  { %v1549_v0 = vpop.permute.xlu0 %1548 }
 0xf04   :  { %v1551_v1 = vmul.f32 %v1549_v0, %v1541_v63 }
 0xf06   :  { %1553 = vrot.lane.b32.xlu0 %v1551_v1, %s3289_s20 }
 0xf0d   :  { %v1571_v5 = vpop.permute.xlu1 %1570 }
 0xf0e   :  { %v1573_v7 = vmul.f32 %v1571_v5, %v1566_v4 }
 0xf10   :  { %1575 = vrot.lane.b32.xlu1 %v1573_v7, %s3289_s20 }
 0xf78   :  { %v1554_v10 = vpop.permute.xlu0 %1553 }
 0xf79   :  { %v3699_v11 = vadd.f32 %v1554_v10, %v1546_v6 }
 0xf7b   :  { %3103 = vtanh.f32 %v3699_v11  ;;  %v1817_v56 = vrot.slane %v3699_v11, 6 }
 0xf82   :  { %v1576_v13 = vpop.permute.xlu1 %1575 }
 0xf83   :  { %v3703_v14 = vadd.f32 %v1576_v13, %v1568_v12 }
 0xf85   :  { %v3104_v15 = vpop.eup %3103  ;;  %3105 = vtanh.f32 %v3703_v14 }
 0xf86   :  { %1559 = vrot.lane.b32.xlu0 %v3104_v15, %s3284_s8 }
 0xf8f   :  { %v3106_v16 = vpop.eup %3105 }
 0xf90   :  { %1581 = vrot.lane.b32.xlu1 %v3106_v16, %s3284_s8 }
 0xff8   :  { %v1560_v18 = vpop.permute.xlu0 %1559 }
 0xff9   :  { %v1562_v21 = vmul.f32 %v1560_v18, %v1541_v63 }
 0xffb   :  { %v1586_v24 = vrot.slane %v1562_v21, 2 }
 0xffd   :  { %1587 = vrot.lane.b32.xlu0 %v1586_v24, %s3289_s20 }
0x1002   :  { %v1582_v25 = vpop.permute.xlu1 %1581 }
0x1003   :  { %v3709_v8 = vmul.f32 %v1582_v25, %v1566_v4 }
0x1005   :  { %1666 = vrot.lane.b32.xlu1 %v3709_v8, %s3289_s20 }
0x106f   :  { %v1588_v26 = vpop.permute.xlu0 %1587 }
0x1070   :  { %2787 = vmatmul.mubr.msk.f32.vlgmr.msra.gmra.mrb[16].mxu0 %vm227_vm2, %v1588_v26 }
0x1071   :  { %2985 = vmatpush3.bf16.msra.mxu0 %v3494_v35  ;;  %2808 = vmatprep.mubr.msk.f32.mxu0 %vm3286_vm1, %v3287_v22 }
0x1072   :  { %2986 = vmatprep.subr.bf16.mxu0 %v3285_v19 }
0x1075   :  { %2988 = vmatpush3.bf16.msra.mxu0 %v3498_v39 }
0x1076   :  { %2995 = vmatprep.subr.bf16.mxu0 %v3285_v19 }
0x1077   :  { %v1667_v28 = vpop.permute.xlu1 %1666 }
0x1078   :  { %2798 = vmatmul.mubr.msk.f32.vlgmr.msra.gmra.mrb[16].mxu1 %vm227_vm2, %v1667_v28  ;;  %2809 = vmatmul.mubr.msk.f32.vlgmr.msra.gmra.mrb[18].mxu0 %vm227_vm2, %v1588_v26 }
0x1079   :  { %2991 = vmatpush3.bf16.msra.mxu1 %v3450_v20  ;;  %2997 = vmatpush3.bf16.msra.mxu0 %v3472_v27 }
0x107a   :  { %2992 = vmatprep.subr.bf16.mxu1 %v3285_v19  ;;  %2819 = vmatprep.mubr.msk.f32.mxu1 %vm3286_vm1, %v3287_v22 }
0x107b   :  { %2998 = vmatprep.subr.bf16.mxu0 %v3285_v19  ;;  %2830 = vmatprep.mubr.msk.f32.mxu0 %vm3286_vm1, %v3287_v22 }
0x107d   :  { %2994 = vmatpush3.bf16.msra.mxu1 %v3461_v23  ;;  %3000 = vmatpush3.bf16.msra.mxu0 %v3482_v30 }
0x107e   :  { %3001 = vmatprep.subr.bf16.mxu1 %v3285_v19  ;;  %3007 = vmatprep.subr.bf16.mxu0 %v3285_v19 }
0x1143   :  { %v1657_v20 = vpop.f32.mrb[16].mxu0 }
0x1144   :  { %v1662_v29 = vrot.slane %v1657_v20, 4  ;;  %v2788_v31 = vpop.f32.mrb[17].mxu0 }
0x1146   :  { %v1664_v32 = vadd.f32 %v1662_v29, %v3647_v60 }
0x1148   :  { %3107 = vtanh.f32 %v1664_v32  ;;  %v1811_v42 = vmul.f32 0.5, %v1664_v32 }
0x114b   :  { %v1736_v33 = vpop.f32.mrb[16].mxu1  ;;  %v1806_v34 = vpop.f32.mrb[18].mxu0 }
0x114c   :  { %v1807_v36 = vadd.f32 %v1806_v34, %v1736_v33  ;;  %v2799_v37 = vpop.f32.mrb[17].mxu1  ;;  %v2810_v38 = vpop.f32.mrb[19].mxu0 }
0x114e   :  { %v1810_v40 = vadd.f32 %v1807_v36, %v3516_v46 }
0x1150   :  { %3109 = vtanh.f32 %v1810_v40  ;;  %v1836_v44 = vmul.f32 0.5, %v1810_v40 }
0x1151   :  { %3111 = vtanh.f32 %v1811_v42 }
0x1152   :  { %v3108_v23 = vpop.eup %3107  ;;  %3113 = vtanh.f32 %v1836_v44 }
0x1153   :  { %1821 = vrot.lane.b32.xlu0 %v3108_v23, %s3284_s8 }
0x115a   :  { %v3110_v41 = vpop.eup %3109 }
0x115b   :  { %1843 = vrot.lane.b32.xlu1 %v3110_v41, %s3284_s8  ;;  %v3112_v45 = vpop.eup %3111 }
0x115c   :  { %v1813_v47 = vmul.f32 0.5, %v3112_v45  ;;  %v3114_v49 = vpop.eup %3113 }
0x115d   :  { %v1838_v52 = vmul.f32 0.5, %v3114_v49 }
0x115e   :  { %v1814_v48 = vadd.f32 0.5, %v1813_v47 }
0x115f   :  { %v1839_v53 = vadd.f32 0.5, %v1838_v52 }
0x1160   :  { %v1819_v57 = vmul.f32 %v1817_v56, %v1814_v48 }
0x1161   :  { %v1841_v17 = vmul.f32 %v1839_v53, %v3703_v14 }
0x11c5   :  { %v1822_v50 = vpop.permute.xlu0 %1821 }
0x11c6   :  { %v1824_v51 = vmul.f32 %v1822_v50, %v1814_v48 }
0x11c8   :  { %1826 = vrot.lane.b32.xlu0 %v1824_v51, %s3289_s20 }
0x11cd   :  { %v1844_v54 = vpop.permute.xlu1 %1843 }
0x11ce   :  { %v1846_v55 = vmul.f32 %v1844_v54, %v1839_v53 }
0x11d0   :  { %1848 = vrot.lane.b32.xlu1 %v1846_v55, %s3289_s20 }
0x123a   :  { %v1827_v58 = vpop.permute.xlu0 %1826 }
0x123b   :  { %v3741_v59 = vadd.f32 %v1827_v58, %v1819_v57 }
0x123d   :  { %3115 = vtanh.f32 %v3741_v59  ;;  %v2090_v32 = vrot.slane %v3741_v59, 6 }
0x1242   :  { %v1849_v61 = vpop.permute.xlu1 %1848 }
0x1243   :  { %v3745_v62 = vadd.f32 %v1849_v61, %v1841_v17 }
0x1245   :  { %3117 = vtanh.f32 %v3745_v62 }
0x1247   :  { %v3116_v63 = vpop.eup %3115 }
0x1248   :  { %1832 = vrot.lane.b32.xlu0 %v3116_v63, %s3284_s8 }
0x124f   :  { %v3118_v0 = vpop.eup %3117 }
0x1250   :  { %1854 = vrot.lane.b32.xlu1 %v3118_v0, %s3284_s8 }
0x12ba   :  { %v1833_v1 = vpop.permute.xlu0 %1832 }
0x12bb   :  { %v1835_v2 = vmul.f32 %v1833_v1, %v1814_v48 }
0x12bd   :  { %v1859_v3 = vrot.slane %v1835_v2, 4 }
0x12bf   :  { %1860 = vrot.lane.b32.xlu0 %v1859_v3, %s3289_s20 }
0x12c2   :  { %v1855_v4 = vpop.permute.xlu1 %1854 }
0x12c3   :  { %v3751_v5 = vmul.f32 %v1855_v4, %v1839_v53 }
0x12c5   :  { %1939 = vrot.lane.b32.xlu1 %v3751_v5, %s3289_s20  ;;  %v2311_v47 = vrot.slane %v3751_v5, 6 }
0x12c7   :  { %v2324_v51 = vsel %vm2318_vm3, %v3709_v8, %v2311_v47 }
0x1331   :  { %v1861_v7 = vpop.permute.xlu0 %1860 }
0x1332   :  { %2820 = vmatmul.mubr.msk.f32.vlgmr.msra.gmra.mrb[18].mxu1 %vm227_vm2, %v1861_v7 }
0x1333   :  { %3003 = vmatpush3.bf16.msra.mxu1 %v3494_v35  ;;  %2841 = vmatprep.mubr.msk.f32.mxu1 %vm3286_vm1, %v3287_v22 }
0x1334   :  { %3004 = vmatprep.subr.bf16.mxu1 %v3285_v19 }
0x1337   :  { %3006 = vmatpush3.bf16.msra.mxu1 %v3498_v39  ;;  %v1940_v9 = vpop.permute.xlu1 %1939 }
0x1338   :  { %2831 = vmatmul.mubr.msk.f32.vlgmr.msra.gmra.mrb[20].mxu0 %vm227_vm2, %v1940_v9  ;;  %3013 = vmatprep.subr.bf16.mxu1 %v3285_v19  ;;  %v115_v9 = vld [vmem:[%s3833_s7 + $0x8] sm:$0xff] }
0x1339   :  { %3009 = vmatpush3.bf16.msra.mxu0 %v3472_v27  ;;  %2852 = vmatprep.mubr.msk.f32.mxu0 %vm3286_vm1, %v3287_v22 }
0x133a   :  { %2842 = vmatmul.mubr.msk.f32.vlgmr.msra.gmra.mrb[20].mxu1 %vm227_vm2, %v1861_v7  ;;  %3010 = vmatprep.subr.bf16.mxu0 %v3285_v19  ;;  %v114_v7 = vld [vmem:[%s3833_s7] sm:$0xff] }
0x133b   :  { %3015 = vmatpush3.bf16.msra.mxu1 %v3494_v35  ;;  %2863 = vmatprep.mubr.msk.f32.mxu1 %vm3286_vm1, %v3287_v22 }
0x133c   :  { %3016 = vmatprep.subr.bf16.mxu1 %v3285_v19 }
0x133d   :  { %3012 = vmatpush3.bf16.msra.mxu0 %v3482_v30 }
0x133f   :  { %3018 = vmatpush3.bf16.msra.mxu1 %v3498_v39 }
0x1405   :  { %v1930_v6 = vpop.f32.mrb[18].mxu1 }
0x1406   :  { %v1935_v27 = vrot.slane %v1930_v6, 2  ;;  %v2821_v10 = vpop.f32.mrb[19].mxu1  ;;  %v116_v6 = vld [vmem:[%s3833_s7 + $0x10] sm:$0xff] }
0x1408   :  { %v1937_v11 = vadd.f32 %v1935_v27, %v3647_v60  ;;  %v117_v27 = vld [vmem:[%s3833_s7 + $0x18] sm:$0xff]  ;;  %s3290_s7 = smov [#allocation11]  }
0x1409   :  { %v3023_v10 = vpack.c.bf16 %v117_v27, %v116_v6 }
0x140a   :  { %3119 = vtanh.f32 %v1937_v11  ;;  %v2084_v30 = vmul.f32 0.5, %v1937_v11 }
0x140b   :  { %v2009_v12 = vpop.f32.mrb[20].mxu0 }
0x140c   :  { %v2832_v13 = vpop.f32.mrb[21].mxu0 }
0x140d   :  { %v2079_v14 = vpop.f32.mrb[20].mxu1 }
0x140e   :  { %v2080_v15 = vadd.f32 %v2079_v14, %v2009_v12  ;;  %v2843_v35 = vpop.f32.mrb[21].mxu1 }
0x1410   :  { %v2083_v16 = vadd.f32 %v2080_v15, %v3516_v46 }
0x1412   :  { %3121 = vtanh.f32 %v2083_v16  ;;  %v2109_v39 = vmul.f32 0.5, %v2083_v16  ;;  %v118_v16 = vld [vmem:[#allocation10] sm:$0xff] }
0x1413   :  { %3123 = vtanh.f32 %v2084_v30 }
0x1414   :  { %v3120_v22 = vpop.eup %3119  ;;  %3125 = vtanh.f32 %v2109_v39  ;;  %v119_v39 = vld [vmem:[#allocation10 + $0x8] sm:$0xff] }
0x1415   :  { %2094 = vrot.lane.b32.xlu0 %v3120_v22, %s3284_s8 }
0x141c   :  { %v3122_v19 = vpop.eup %3121 }
0x141d   :  { %2116 = vrot.lane.b32.xlu1 %v3122_v19, %s3284_s8  ;;  %v3124_v60 = vpop.eup %3123 }
0x141e   :  { %v2086_v18 = vmul.f32 0.5, %v3124_v60  ;;  %v3126_v24 = vpop.eup %3125 }
0x141f   :  { %v2111_v28 = vmul.f32 0.5, %v3126_v24 }
0x1420   :  { %v2087_v21 = vadd.f32 0.5, %v2086_v18 }
0x1421   :  { %v2112_v20 = vadd.f32 0.5, %v2111_v28 }
0x1422   :  { %v2092_v33 = vmul.f32 %v2090_v32, %v2087_v21 }
0x1423   :  { %v2114_v37 = vmul.f32 %v2112_v20, %v3745_v62 }
0x1487   :  { %v2095_v25 = vpop.permute.xlu0 %2094 }
0x1488   :  { %v2097_v26 = vmul.f32 %v2095_v25, %v2087_v21 }
0x148a   :  { %2099 = vrot.lane.b32.xlu0 %v2097_v26, %s3289_s20 }
0x148f   :  { %v2117_v29 = vpop.permute.xlu1 %2116 }
0x1490   :  { %v2119_v31 = vmul.f32 %v2117_v29, %v2112_v20 }
0x1492   :  { %2121 = vrot.lane.b32.xlu1 %v2119_v31, %s3289_s20 }
0x14fc   :  { %v2100_v34 = vpop.permute.xlu0 %2099 }
0x14fd   :  { %v2102_v36 = vadd.f32 %v2100_v34, %v2092_v33 }
0x14ff   :  { %3127 = vtanh.f32 %v2102_v36 }
0x1504   :  { %v2122_v38 = vpop.permute.xlu1 %2121 }
0x1505   :  { %v2124_v40 = vadd.f32 %v2122_v38, %v2114_v37 }
0x1507   :  { %3129 = vtanh.f32 %v2124_v40 }
0x1509   :  { %v3128_v23 = vpop.eup %3127 }
0x150a   :  { %2105 = vrot.lane.b32.xlu0 %v3128_v23, %s3284_s8 }
0x1511   :  { %v3130_v41 = vpop.eup %3129 }
0x1512   :  { %2127 = vrot.lane.b32.xlu1 %v3130_v41, %s3284_s8 }
0x157c   :  { %v2106_v42 = vpop.permute.xlu0 %2105 }
0x157d   :  { %v2108_v44 = vmul.f32 %v2106_v42, %v2087_v21 }
0x157f   :  { %v2207_v45 = vrot.slane %v2108_v44, 6 }
0x1581   :  { %2208 = vrot.lane.b32.xlu1 %v2207_v45, %s3289_s20 }
0x1584   :  { %v2128_v48 = vpop.permute.xlu1 %2127 }
0x1585   :  { %v2130_v49 = vmul.f32 %v2128_v48, %v2112_v20 }
0x1587   :  { %v2313_v50 = vrot.slane %v2130_v49, 4  ;;  %2132 = vrot.lane.b32.xlu0 %v2130_v49, %s3289_s20 }
0x1589   :  { %v2325_v52 = vsel %vm2320_vm4, %v2324_v51, %v2313_v50 }
0x15f3   :  { %v2209_v53 = vpop.permute.xlu1 %2208 }
0x15f4   :  { %2864 = vmatmul.mubr.msk.f32.vlgmr.msra.gmra.mrb[22].mxu1 %vm227_vm2, %v2209_v53 }
0x15f9   :  { %v2133_v54 = vpop.permute.xlu0 %2132 }
0x15fa   :  { %2853 = vmatmul.mubr.msk.f32.vlgmr.msra.gmra.mrb[22].mxu0 %vm227_vm2, %v2133_v54 }
0x16c7   :  { %v2278_v55 = vpop.f32.mrb[22].mxu1 }
0x16c8   :  { %v2865_v56 = vpop.f32.mrb[23].mxu1 }
0x16cd   :  { %v2202_v57 = vpop.f32.mrb[22].mxu0 }
0x16ce   :  { %v2279_v58 = vadd.f32 %v2278_v55, %v2202_v57  ;;  %v2854_v59 = vpop.f32.mrb[23].mxu0 }
0x16d0   :  { %v2282_v17 = vadd.f32 %v2279_v58, %v3516_v46 }
0x16d2   :  { %3131 = vtanh.f32 %v2282_v17  ;;  %v2283_v8 = vmul.f32 0.5, %v2282_v17 }
0x16d4   :  { %3133 = vtanh.f32 %v2283_v8 }
0x16dc   :  { %v3132_v61 = vpop.eup %3131 }
0x16dd   :  { %2290 = vrot.lane.b32.xlu0 %v3132_v61, %s3284_s8 }
0x16de   :  { %v3134_v62 = vpop.eup %3133 }
0x16df   :  { %v2285_v63 = vmul.f32 0.5, %v3134_v62 }
0x16e1   :  { %v2286_v0 = vadd.f32 0.5, %v2285_v63 }
0x16e3   :  { %v2288_v3 = vmul.f32 %v2286_v0, %v2124_v40 }
0x174f   :  { %v2291_v1 = vpop.permute.xlu0 %2290 }
0x1750   :  { %v2293_v2 = vmul.f32 %v2291_v1, %v2286_v0 }
0x1752   :  { %2295 = vrot.lane.b32.xlu1 %v2293_v2, %s3289_s20 }
0x1756   :  { %2329 = vrot.lane.b32.xlu1 %v3669_v43, %s3289_s20  ;;  %v3019_v43 = vpack.c.bf16 %v115_v9, %v114_v7 }
0x1758   :  { %3020 = vmatprep.subr.bf16.mxu0 %v3019_v43 }
0x1759   :  { %3022 = vmatpush3.bf16.msra.mxu0 %v3019_v43 }
0x175a   :  { %3024 = vmatprep.subr.bf16.mxu0 %v3023_v10 }
0x175d   :  { %3026 = vmatpush3.bf16.msra.mxu0 %v3023_v10 }
0x17c4   :  { %v2296_v4 = vpop.permute.xlu1 %2295 }
0x17c5   :  { %v2298_v5 = vadd.f32 %v2296_v4, %v2288_v3 }
0x17c7   :  { %3135 = vtanh.f32 %v2298_v5 }
0x17c8   :  { %v2330_v46 = vpop.permute.xlu1 %2329 }
0x17c9   :  { %2874 = vmatprep.mubr.msk.f32.mxu0 %vm227_vm2, %v2330_v46 }
0x17d1   :  { %v3136_v11 = vpop.eup %3135 }
0x17d2   :  { %2301 = vrot.lane.b32.xlu0 %v3136_v11, %s3284_s8  ;;  %s2444_s8 = sshll.u32 %s3290_s7, 4  ;;  %s2445_s8 = int_to_ptr.vmem [resolvable:$true] %s2444_s8 }
0x17d3   :  { %s3247_s21 = scalar_lea.vmem %s2445_s8, 32  ;;  %p3252_p13 = scmp.lt.s32.totalorder %s2445_s8, %s2445_s8 }
0x17d4   :  { %p3248_p12 = scmp.ne.s32.totalorder %s2445_s8, %s3247_s21  ;;  %p3253_p0 = scmp.lt.s32.totalorder %s3247_s21, %s3247_s21 }
0x17d6   :  { %p3254_p1 = por %p3253_p0, %p3252_p13 }
0x17d8   :  { %p3255_p2 = pnand %p3254_p1, %p3248_p12 }
0x1844   :  { %v2302_v12 = vpop.permute.xlu0 %2301 }
0x1845   :  { %v2304_v13 = vmul.f32 %v2302_v12, %v2286_v0 }
0x1847   :  { %v2316_v14 = vrot.slane %v2304_v13, 2 }
0x1849   :  { %v2326_v15 = vsel %vm2322_vm5, %v2325_v52, %v2316_v14 }
0x184a   :  { %2331 = vrot.lane.b32.xlu0 %v2326_v15, %s3289_s20 }
0x18bc   :  { %v2332_v35 = vpop.permute.xlu0 %2331 }
0x18bd   :  { %2875 = vmatmul.mubr.msk.f32.vlgmr.msra.gmra.mrb[24].mxu0 %vm227_vm2, %v2332_v35 }
0x1990   :  { %v2876_v22 = vpop.f32.mrb[24].mxu0 }
0x1991   :  { %v2403_v19 = vpop.f32.mrb[25].mxu0  ;;  %v2409_v18 = vadd.f32 %v2876_v22, %v119_v39 }
0x1992   :  { %v2404_v30 = vadd.f32 %v2403_v19, %v118_v16 }
0x1993   :  { %v2413_v26 = vmax.f32 %v2409_v18, 0.0 }
0x1994   :  { %v2412_v60 = vmax.f32 %v2404_v30, 0.0 }
0x1995   :  { %v2426_v31 = vrot.slane %v2413_v26, 2  ;;  %v2429_v33 = vrot.slane %v2413_v26, 4  ;;  %v2432_v37 = vrot.slane %v2413_v26, 6 }
0x1996   :  { %v2415_v21 = vrot.slane %v2412_v60, 2  ;;  %v2418_v25 = vrot.slane %v2412_v60, 4  ;;  %v2421_v20 = vrot.slane %v2412_v60, 6 }
0x1998   :  { %v2417_v24 = vadd.f32 %v2415_v21, %v2412_v60 }
0x199a   :  { %v2420_v28 = vadd.f32 %v2418_v25, %v2417_v24 }
0x199c   :  { %v2423_v29 = vadd.f32 %v2421_v20, %v2420_v28 }
0x199e   :  { %v2424_v32 = vadd.f32 %v2423_v29, %v2413_v26 }
0x19a0   :  { %v2428_v34 = vadd.f32 %v2426_v31, %v2424_v32 }
0x19a2   :  { %v2431_v36 = vadd.f32 %v2429_v33, %v2428_v34 }
0x19a4   :  { %v2434_v38 = vadd.f32 %v2432_v37, %v2431_v36 }
0x19a6   :  { %v2435_v40 = vmul.f32 0.125, %v2434_v38 }
0x19a8   :  { %2437 = vst.msk [vmem:[#allocation11] sm:$0x3] %vm2436_vm6, %v2435_v40 }
0x19a9   :  { %3258 = shalt.err (!%p3255_p2)
}
0x19aa   :  { %s3259_s28 = scalar_lea.hbm %s3835_s9, 32 }
0x19ab   :  { %p3260_p3 = scmp.ne.s32.totalorder %s3835_s9, %s3259_s28  ;;  %p3263_p4 = scmp.lt.u32.totalorder %s3259_s28, %s3835_s9 }
0x19ad   :  { %p3265_p5 = pnand %p3263_p4, %p3260_p3 }
0x19af   :  { %3268 = shalt.err (!%p3265_p5)
}
0x19b0   :  { %2447 = dma.vmem_to_hbm [thread:$0]  %s2445_s8, 32, %s3835_s9, [#allocation4]  }
0x19b1   :  { %3275 = dma.done.wait [#allocation4], 32  }
0x19b2   :  { %3276 = vsyncadd [#allocation4], 4294967264 }
0x19b3   :  { %2451 = vsyncpa [#allocation3], 1 }
0x19b4   :  { %2452 = vsyncpa [#allocation6], 1 }
0x19b5   :  { %2453 = vsyncpa [#allocation9], 1 }
0x19b6   :  { %2454 = vsyncpa [#allocation4], 1 }

</bundles_post_ra>
